<compile_context>
chip_gen: v7x
topology: tpu7x:2x2x1
jax: 0.10.0
libtpu: 0.0.40
codegen_flags: <defaults>
</compile_context>

<pallas_src>
import functools

import jax
import jax.numpy as jnp
from jax.experimental import pallas as pl
from jax.experimental.pallas import tpu as pltpu


def attention_pool_kernel(x_ref, kb_ref, vb_ref, wqkv0_ref, b0_ref,
                          wk_ref, wv_ref, mblk_ref, wc_ref, bc_ref,
                          o_ref, tok_ref, *, scale):
    """Class-token-only AttentionPool2d forward for one batch tile.

    x_ref    : (bt, C, HW)  raw channel-major activations (no wrapper transpose)
    kb_ref   : (HW, C) f32  fused K bias   (pos_sp @ Wk + bk)
    vb_ref   : (HW, C) f32  fused V bias   (pos_sp @ Wv + bv)
    wqkv0_ref: (C, 3C) bf16 QKV weight (mean token only -> one MXU launch)
    b0_ref   : (1, 3C) f32  fused QKV bias (pos0 @ Wqkv + b_qkv)
    wk_ref   : (C, C)  bf16 K weight (spatial tokens)
    wv_ref   : (C, C)  bf16 V weight (spatial tokens)
    mblk_ref : (C, C)  bf16 block-diagonal head-membership matrix (0/1)
    wc_ref   : (C, Dout) bf16 ; bc_ref: (1, Dout) f32 output projection
    o_ref    : (bt, Dout) f32 output rows
    tok_ref  : (bt*HW, C) bf16 VMEM scratch (token-major activations)
    """
    bt, C, HW = x_ref.shape

    xs = x_ref[...]                                                  # (bt, C, HW)

    # class ("mean") token -- accumulate in f32 regardless of input dtype.
    tok0 = jnp.mean(xs.astype(jnp.float32), axis=2)                  # (bt, C)

    # On-chip corner turn: channel-major -> token-major, bf16 for the MXU.
    # Static unroll over the (small) batch tile; 2D transposes go to the XLU.
    for b in range(bt):
        tok_ref[b * HW:(b + 1) * HW, :] = xs[b].T.astype(jnp.bfloat16)
    tok_sp = tok_ref[...]                                            # (bt*HW, C)

    # Mean-token q/k/v: one fused MXU launch (M = bt).
    q0kv = (jnp.dot(tok0.astype(jnp.bfloat16), wqkv0_ref[...],
                    preferred_element_type=jnp.float32) + b0_ref[...])   # (bt, 3C)
    q0 = q0kv[:, 0 * C:1 * C] * scale          # fold 1/sqrt(ch) into q once
    k0 = q0kv[:, 1 * C:2 * C]
    v0 = q0kv[:, 2 * C:3 * C]

    # Spatial K projection; pos-emb + bias pre-folded into kb_ref.
    k_sp = jnp.dot(tok_sp, wk_ref[...],
                   preferred_element_type=jnp.float32).reshape(bt, HW, C)
    k_sp = k_sp + kb_ref[...][None]                                  # (bt, HW, C)

    # Per-head class-token scores, broadcast across each head's channels with a
    # block-diagonal 0/1 matrix -> the whole softmax path is lane-dense over C.
    # TODO(synk): for C > ~256 restructure with hw on the lane axis instead.
    mblk = mblk_ref[...]
    qk = (q0[:, None, :] * k_sp).reshape(bt * HW, C)                 # (bt*HW, C)
    s_sp = jnp.dot(qk.astype(jnp.bfloat16), mblk,
                   preferred_element_type=jnp.float32).reshape(bt, HW, C)
    s0 = jnp.dot((q0 * k0).astype(jnp.bfloat16), mblk,
                 preferred_element_type=jnp.float32)                 # (bt, C)

    # Stable softmax over {mean token} U {spatial tokens} (constant per head).
    m = jnp.maximum(jnp.max(s_sp, axis=1), s0)                       # (bt, C)
    e_sp = jnp.exp(s_sp - m[:, None, :])                             # (bt, HW, C)
    e0 = jnp.exp(s0 - m)                                             # (bt, C)
    denom = e0 + jnp.sum(e_sp, axis=1)                               # (bt, C)

    # Spatial V projection deferred so k_sp / s_sp die before v_sp goes live.
    # TODO(synk): for very large HW*C, chunk hw with online-softmax accumulators.
    v_sp = jnp.dot(tok_sp, wv_ref[...],
                   preferred_element_type=jnp.float32).reshape(bt, HW, C)
    v_sp = v_sp + vb_ref[...][None]                                  # (bt, HW, C)
    numer = e0 * v0 + jnp.sum(e_sp * v_sp, axis=1)                   # (bt, C)

    # Exact divide (tiny (bt, C) tensor); avoids the approx-reciprocal error.
    attn0 = numer / denom

    out = (jnp.dot(attn0.astype(jnp.bfloat16), wc_ref[...],
                   preferred_element_type=jnp.float32) + bc_ref[...])    # (bt, Dout)
    o_ref[...] = out


def attention_pool_2d(x, pos_emb, w_qkv, b_qkv, w_c, b_c, *, num_heads,
                      batch_block=None):
    """AttentionPool2d forward.

    x      : [B, C, H, W] (NCHW, like PyTorch)
    pos_emb: [C, H*W + 1]
    w_qkv  : [C, 3C]   (conv1d kernel-size-1 weight stored as [C_in, C_out])
    b_qkv  : [3C] or [1, 3C]
    w_c    : [C, Dout] ; b_c: [Dout] or [1, Dout]
    returns [B, Dout]   (token 0 of c_proj output)
    """
    B, C, H, W = x.shape
    HW = H * W
    Dout = w_c.shape[-1]
    assert C % num_heads == 0
    ch = C // num_heads
    scale = 1.0 / float(ch) ** 0.5

    # x: free reshape only -- no transpose, no dtype cast, no extra HBM pass.
    x_cm = x.reshape(B, C, HW)

    # ---- parameter prep (tiny, runs on weights only) ----
    w_qkv = w_qkv.astype(jnp.float32).reshape(C, 3 * C)
    b_qkv = b_qkv.reshape(1, 3 * C).astype(jnp.float32)
    pos_t = jnp.transpose(pos_emb.astype(jnp.float32), (1, 0))      # [T, C]
    pos0, pos_sp = pos_t[0:1], pos_t[1:]                            # [1,C], [HW,C]

    w_k = w_qkv[:, 1 * C:2 * C]
    w_v = w_qkv[:, 2 * C:3 * C]
    # fused per-token biases: positional embedding folded into the projection bias
    kb_sp = pos_sp @ w_k + b_qkv[:, 1 * C:2 * C]                     # [HW, C]
    vb_sp = pos_sp @ w_v + b_qkv[:, 2 * C:3 * C]                     # [HW, C]
    b0 = pos0 @ w_qkv + b_qkv                                        # [1, 3C]

    wqkv0_b = w_qkv.astype(jnp.bfloat16)                             # [C, 3C]
    wk_b = w_k.astype(jnp.bfloat16)
    wv_b = w_v.astype(jnp.bfloat16)
    wc_b = w_c.reshape(C, Dout).astype(jnp.bfloat16)
    bc = b_c.reshape(1, Dout).astype(jnp.float32)

    # block-diagonal head-membership matrix (exact in bf16: 0/1 entries)
    cidx = jnp.arange(C)
    mblk = (cidx[:, None] // ch == cidx[None, :] // ch).astype(jnp.bfloat16)

    # ---- batch tile: target M = bt*HW >= 256, >= 2 grid steps, modest VMEM ----
    if batch_block is None:
        bt = max(1, -(-256 // HW))               # ceil(256 / HW)
        bt = min(bt, B)
        while bt > 1 and B // bt < 2:            # keep >= 2 steps (megacore/v7x)
            bt -= 1
        # rough per-batch working set: f32 x block (double-buffered) + ~5 live
        # f32 [HW, C] temporaries; keep the tile comfortably inside v7x VMEM.
        vmem_budget = 16 * 1024 * 1024
        per_batch = HW * C * 4 * 7
        while bt > 1 and bt * per_batch > vmem_budget:
            bt -= 1
    else:
        bt = batch_block
    bt = max(1, min(bt, B))
    while B % bt:
        bt -= 1
    nb = B // bt
    # TODO(synk): pad B (keeping nb even for v7x's two TensorCores) instead of
    # letting awkward B degrade bt; chunk HW with an online softmax if HW*C is
    # too large for a single tile.

    kernel = functools.partial(attention_pool_kernel, scale=scale)

    def _call(single_buffer):
        kw = dict(pipeline_mode=pl.Buffered(1)) if single_buffer else {}

        def const(shape):
            return pl.BlockSpec(shape, lambda i: (0,) * len(shape), **kw)

        in_specs = [
            pl.BlockSpec((bt, C, HW), lambda i: (i, 0, 0)),          # x (pipelined)
            const((HW, C)),          # kb_sp
            const((HW, C)),          # vb_sp
            const((C, 3 * C)),       # wqkv0
            const((1, 3 * C)),       # b0
            const((C, C)),           # wk
            const((C, C)),           # wv
            const((C, C)),           # mblk
            const((C, Dout)),        # wc
            const((1, Dout)),        # bc
        ]
        out_spec = pl.BlockSpec((None, bt, Dout), lambda i: (i, 0, 0))

        return pl.pallas_call(
            kernel,
            out_shape=jax.ShapeDtypeStruct((nb, bt, Dout), jnp.float32),
            grid_spec=pltpu.PrefetchScalarGridSpec(
                num_scalar_prefetch=0,
                grid=(nb,),
                in_specs=in_specs,
                out_specs=out_spec,
                scratch_shapes=[pltpu.VMEM((bt * HW, C), jnp.bfloat16)],
            ),
            compiler_params=pltpu.CompilerParams(
                dimension_semantics=("parallel",),
                # explicit scoped-VMEM limit, within every generation's physical
                # capacity (v7x: 64 MiB physical).
                vmem_limit_bytes=40 * 1024 * 1024,
            ),
        )(x_cm, kb_sp, vb_sp, wqkv0_b, b0, wk_b, wv_b, mblk, wc_b, bc)

    try:
        out = _call(True)        # single-buffer the grid-invariant operands
    except Exception:            # older jax without BlockSpec pipeline_mode
        out = _call(False)

    return out.reshape(B, Dout)


def attention_pool_2d_reference(x, pos_emb, w_qkv, b_qkv, w_c, b_c, *, num_heads):
    """Pure-JAX (f32) mirror of the PyTorch forward, for verification."""
    B, C, H, W = x.shape
    T = H * W + 1
    ch = C // num_heads
    xf = x.reshape(B, C, H * W)
    xf = jnp.concatenate([xf.mean(axis=-1, keepdims=True), xf], axis=-1)
    xf = xf + pos_emb[None]
    qkv = jnp.einsum('co,bct->bot', w_qkv, xf) + b_qkv.reshape(1, -1, 1)
    q, k, v = jnp.split(qkv, 3, axis=1)
    q = q.reshape(B * num_heads, ch, T).transpose(0, 2, 1)
    k = k.reshape(B * num_heads, ch, T).transpose(0, 2, 1)
    v = v.reshape(B * num_heads, ch, T).transpose(0, 2, 1)
    s = jnp.einsum('btc,bsc->bts', q, k) / jnp.sqrt(jnp.float32(ch))
    p = jax.nn.softmax(s, axis=-1)
    a = jnp.einsum('bts,bsc->btc', p, v)
    a = a.transpose(0, 2, 1).reshape(B, C, T)
    out = jnp.einsum('co,bct->bot', w_c, a) + b_c.reshape(1, -1, 1)
    return out[:, :, 0]


if __name__ == "__main__":
    # Module hyper-parameters (small, consistent with AttentionPool2d.__init__)
    B = 2
    spacial_dim = 4          # H = W = 4  -> T = 17
    embed_dim = 32           # C
    num_heads_channels = 8   # -> num_heads = 4
    output_dim = 32

    num_heads = embed_dim // num_heads_channels
    T = spacial_dim ** 2 + 1

    key = jax.random.PRNGKey(0)
    k_x, k_pos, k_wq, k_bq, k_wc, k_bc = jax.random.split(key, 6)

    # Deterministic synthetic parameters (conv1d kernel-size-1 weights stored
    # pre-transposed as [C_in, C_out]).
    x = jax.random.normal(k_x, (B, embed_dim, spacial_dim, spacial_dim), jnp.float32)
    pos_emb = jax.random.normal(k_pos, (embed_dim, T), jnp.float32) / embed_dim ** 0.5
    w_qkv = jax.random.normal(k_wq, (embed_dim, 3 * embed_dim), jnp.float32) * 0.05
    b_qkv = jax.random.normal(k_bq, (1, 3 * embed_dim), jnp.float32) * 0.05
    w_c = jax.random.normal(k_wc, (embed_dim, output_dim), jnp.float32) * 0.05
    b_c = jax.random.normal(k_bc, (1, output_dim), jnp.float32) * 0.05

    out = attention_pool_2d(x, pos_emb, w_qkv, b_qkv, w_c, b_c, num_heads=num_heads)
    out = jax.block_until_ready(out)

    ref = attention_pool_2d_reference(x, pos_emb, w_qkv, b_qkv, w_c, b_c,
                                      num_heads=num_heads)
    ref = jax.block_until_ready(ref)

    assert out.shape == (B, output_dim), out.shape
    # bf16 matmul operands (x, q*k, weights) -> slightly looser tolerance vs f32 ref
    assert jnp.allclose(out, ref, rtol=2e-2, atol=1e-2), (
        f"max abs err {jnp.max(jnp.abs(out - ref))}")

    print("KERNEL_OK")
</pallas_src>

<mosaic_0001>
module attributes {stable_mosaic.version = 11 : i64} {
  func.func @attention_pool_kernel(%arg0: i32, %arg1: memref<1x32x16xf32, #tpu.memory_space<vmem>>, %arg2: memref<16x32xf32, #tpu.memory_space<vmem>>, %arg3: memref<16x32xf32, #tpu.memory_space<vmem>>, %arg4: memref<32x96xbf16, #tpu.memory_space<vmem>>, %arg5: memref<1x96xf32, #tpu.memory_space<vmem>>, %arg6: memref<32x32xbf16, #tpu.memory_space<vmem>>, %arg7: memref<32x32xbf16, #tpu.memory_space<vmem>>, %arg8: memref<32x32xbf16, #tpu.memory_space<vmem>>, %arg9: memref<32x32xbf16, #tpu.memory_space<vmem>>, %arg10: memref<1x32xf32, #tpu.memory_space<vmem>>, %arg11: memref<1x1x32xf32, #tpu.memory_space<vmem>>, %arg12: memref<16x32xbf16, #tpu.memory_space<vmem>>) attributes {dimension_semantics = [#tpu.dimension_semantics<parallel>], iteration_bounds = array<i64: 2>, scalar_prefetch = 0 : i64, scratch_operands = 1 : i64, tpu.core_type = #tpu.core_type<tc>, window_params = [{transform_indices = @transform_0, window_bounds = array<i64: 1, 32, 16>}, {pipeline_mode = #tpu.pipeline_mode<synchronous>, transform_indices = @transform_1, window_bounds = array<i64: 16, 32>}, {pipeline_mode = #tpu.pipeline_mode<synchronous>, transform_indices = @transform_2, window_bounds = array<i64: 16, 32>}, {pipeline_mode = #tpu.pipeline_mode<synchronous>, transform_indices = @transform_3, window_bounds = array<i64: 32, 96>}, {pipeline_mode = #tpu.pipeline_mode<synchronous>, transform_indices = @transform_4, window_bounds = array<i64: 1, 96>}, {pipeline_mode = #tpu.pipeline_mode<synchronous>, transform_indices = @transform_5, window_bounds = array<i64: 32, 32>}, {pipeline_mode = #tpu.pipeline_mode<synchronous>, transform_indices = @transform_6, window_bounds = array<i64: 32, 32>}, {pipeline_mode = #tpu.pipeline_mode<synchronous>, transform_indices = @transform_7, window_bounds = array<i64: 32, 32>}, {pipeline_mode = #tpu.pipeline_mode<synchronous>, transform_indices = @transform_8, window_bounds = array<i64: 32, 32>}, {pipeline_mode = #tpu.pipeline_mode<synchronous>, transform_indices = @transform_9, window_bounds = array<i64: 1, 32>}, {transform_indices = @transform_10, window_bounds = array<i64: 1, 1, 32>}]} {
    %c0 = arith.constant 0 : index
    %c0_0 = arith.constant 0 : index
    %c0_1 = arith.constant 0 : index
    %0 = vector.load %arg1[%c0, %c0_0, %c0_1] : memref<1x32x16xf32, #tpu.memory_space<vmem>>, vector<1x32x16xf32>
    %cst = arith.constant dense<0.000000e+00> : vector<1x32xf32>
    %1 = vector.multi_reduction <add>, %0, %cst [2] : vector<1x32x16xf32> to vector<1x32xf32>
    %cst_2 = arith.constant 1.600000e+01 : f32
    %2 = vector.broadcast %cst_2 : f32 to vector<1x32xf32>
    %3 = arith.divf %1, %2 : vector<1x32xf32>
    %4 = vector.shape_cast %0 : vector<1x32x16xf32> to vector<32x16xf32>
    %5 = tpu.transpose %4, [1, 0] : vector<32x16xf32> -> vector<16x32xf32>
    %6 = arith.truncf %5 : vector<16x32xf32> to vector<16x32xbf16>
    %c0_3 = arith.constant 0 : index
    %c0_4 = arith.constant 0 : index
    %7 = vector.load %arg12[%c0_3, %c0_4] : memref<16x32xbf16, #tpu.memory_space<vmem>>, vector<16x32xbf16>
    tpu.vector_store %arg12[%c0_3, %c0_4], %6 {strides = array<i32>} : memref<16x32xbf16, #tpu.memory_space<vmem>>, vector<16x32xbf16>,
    %c0_5 = arith.constant 0 : index
    %c0_6 = arith.constant 0 : index
    %8 = vector.load %arg12[%c0_5, %c0_6] : memref<16x32xbf16, #tpu.memory_space<vmem>>, vector<16x32xbf16>
    %9 = arith.truncf %3 : vector<1x32xf32> to vector<1x32xbf16>
    %c0_7 = arith.constant 0 : index
    %c0_8 = arith.constant 0 : index
    %10 = vector.load %arg4[%c0_7, %c0_8] : memref<32x96xbf16, #tpu.memory_space<vmem>>, vector<32x96xbf16>
    %cst_9 = arith.constant dense<0.000000e+00> : vector<1x96xf32>
    %11 = tpu.matmul %9, %10, %cst_9 {dimension_numbers = #tpu.dot_dimension_numbers<[1], [0], [0], [1], [0, 0, 1, 1], [], []>} : vector<1x32xbf16>, vector<32x96xbf16>, vector<1x96xf32> -> vector<1x96xf32>
    %c0_10 = arith.constant 0 : index
    %c0_11 = arith.constant 0 : index
    %12 = vector.load %arg5[%c0_10, %c0_11] : memref<1x96xf32, #tpu.memory_space<vmem>>, vector<1x96xf32>
    %13 = arith.addf %11, %12 : vector<1x96xf32>
    %14 = vector.extract_strided_slice %13 {offsets = [0, 0], sizes = [1, 32], strides = [1, 1]} : vector<1x96xf32> to vector<1x32xf32>
    %cst_12 = arith.constant 0.353553385 : f32
    %15 = vector.broadcast %cst_12 : f32 to vector<1x32xf32>
    %16 = arith.mulf %14, %15 : vector<1x32xf32>
    %17 = vector.extract_strided_slice %13 {offsets = [0, 32], sizes = [1, 32], strides = [1, 1]} : vector<1x96xf32> to vector<1x32xf32>
    %18 = vector.extract_strided_slice %13 {offsets = [0, 64], sizes = [1, 32], strides = [1, 1]} : vector<1x96xf32> to vector<1x32xf32>
    %c0_13 = arith.constant 0 : index
    %c0_14 = arith.constant 0 : index
    %19 = vector.load %arg6[%c0_13, %c0_14] : memref<32x32xbf16, #tpu.memory_space<vmem>>, vector<32x32xbf16>
    %cst_15 = arith.constant dense<0.000000e+00> : vector<16x32xf32>
    %20 = tpu.matmul %8, %19, %cst_15 {dimension_numbers = #tpu.dot_dimension_numbers<[1], [0], [0], [1], [0, 0, 1, 1], [], []>} : vector<16x32xbf16>, vector<32x32xbf16>, vector<16x32xf32> -> vector<16x32xf32>
    %21 = vector.shape_cast %20 : vector<16x32xf32> to vector<1x16x32xf32>
    %c0_16 = arith.constant 0 : index
    %c0_17 = arith.constant 0 : index
    %22 = vector.load %arg2[%c0_16, %c0_17] : memref<16x32xf32, #tpu.memory_space<vmem>>, vector<16x32xf32>
    %23 = vector.shape_cast %22 : vector<16x32xf32> to vector<1x16x32xf32>
    %24 = arith.addf %21, %23 : vector<1x16x32xf32>
    %c0_18 = arith.constant 0 : index
    %c0_19 = arith.constant 0 : index
    %25 = vector.load %arg8[%c0_18, %c0_19] : memref<32x32xbf16, #tpu.memory_space<vmem>>, vector<32x32xbf16>
    %26 = vector.shape_cast %16 : vector<1x32xf32> to vector<1x1x32xf32>
    %27 = vector.broadcast %26 : vector<1x1x32xf32> to vector<1x16x32xf32>
    %28 = arith.mulf %27, %24 : vector<1x16x32xf32>
    %29 = vector.shape_cast %28 : vector<1x16x32xf32> to vector<16x32xf32>
    %30 = arith.truncf %29 : vector<16x32xf32> to vector<16x32xbf16>
    %cst_20 = arith.constant dense<0.000000e+00> : vector<16x32xf32>
    %31 = tpu.matmul %30, %25, %cst_20 {dimension_numbers = #tpu.dot_dimension_numbers<[1], [0], [0], [1], [0, 0, 1, 1], [], []>} : vector<16x32xbf16>, vector<32x32xbf16>, vector<16x32xf32> -> vector<16x32xf32>
    %32 = vector.shape_cast %31 : vector<16x32xf32> to vector<1x16x32xf32>
    %33 = arith.mulf %16, %17 : vector<1x32xf32>
    %34 = arith.truncf %33 : vector<1x32xf32> to vector<1x32xbf16>
    %cst_21 = arith.constant dense<0.000000e+00> : vector<1x32xf32>
    %35 = tpu.matmul %34, %25, %cst_21 {dimension_numbers = #tpu.dot_dimension_numbers<[1], [0], [0], [1], [0, 0, 1, 1], [], []>} : vector<1x32xbf16>, vector<32x32xbf16>, vector<1x32xf32> -> vector<1x32xf32>
    %cst_22 = arith.constant dense<0xFF800000> : vector<1x32xf32>
    %36 = vector.multi_reduction <maximumf>, %32, %cst_22 [1] : vector<1x16x32xf32> to vector<1x32xf32>
    %37 = arith.maximumf %36, %35 : vector<1x32xf32>
    %38 = vector.shape_cast %37 : vector<1x32xf32> to vector<1x1x32xf32>
    %39 = vector.broadcast %38 : vector<1x1x32xf32> to vector<1x16x32xf32>
    %40 = arith.subf %32, %39 : vector<1x16x32xf32>
    %41 = math.exp %40 : vector<1x16x32xf32>
    %42 = arith.subf %35, %37 : vector<1x32xf32>
    %43 = math.exp %42 : vector<1x32xf32>
    %cst_23 = arith.constant dense<0.000000e+00> : vector<1x32xf32>
    %44 = vector.multi_reduction <add>, %41, %cst_23 [1] : vector<1x16x32xf32> to vector<1x32xf32>
    %45 = arith.addf %43, %44 : vector<1x32xf32>
    %c0_24 = arith.constant 0 : index
    %c0_25 = arith.constant 0 : index
    %46 = vector.load %arg7[%c0_24, %c0_25] : memref<32x32xbf16, #tpu.memory_space<vmem>>, vector<32x32xbf16>
    %cst_26 = arith.constant dense<0.000000e+00> : vector<16x32xf32>
    %47 = tpu.matmul %8, %46, %cst_26 {dimension_numbers = #tpu.dot_dimension_numbers<[1], [0], [0], [1], [0, 0, 1, 1], [], []>} : vector<16x32xbf16>, vector<32x32xbf16>, vector<16x32xf32> -> vector<16x32xf32>
    %48 = vector.shape_cast %47 : vector<16x32xf32> to vector<1x16x32xf32>
    %c0_27 = arith.constant 0 : index
    %c0_28 = arith.constant 0 : index
    %49 = vector.load %arg3[%c0_27, %c0_28] : memref<16x32xf32, #tpu.memory_space<vmem>>, vector<16x32xf32>
    %50 = vector.shape_cast %49 : vector<16x32xf32> to vector<1x16x32xf32>
    %51 = arith.addf %48, %50 : vector<1x16x32xf32>
    %52 = arith.mulf %43, %18 : vector<1x32xf32>
    %53 = arith.mulf %41, %51 : vector<1x16x32xf32>
    %cst_29 = arith.constant dense<0.000000e+00> : vector<1x32xf32>
    %54 = vector.multi_reduction <add>, %53, %cst_29 [1] : vector<1x16x32xf32> to vector<1x32xf32>
    %55 = arith.addf %52, %54 : vector<1x32xf32>
    %56 = arith.divf %55, %45 : vector<1x32xf32>
    %57 = arith.truncf %56 : vector<1x32xf32> to vector<1x32xbf16>
    %c0_30 = arith.constant 0 : index
    %c0_31 = arith.constant 0 : index
    %58 = vector.load %arg9[%c0_30, %c0_31] : memref<32x32xbf16, #tpu.memory_space<vmem>>, vector<32x32xbf16>
    %cst_32 = arith.constant dense<0.000000e+00> : vector<1x32xf32>
    %59 = tpu.matmul %57, %58, %cst_32 {dimension_numbers = #tpu.dot_dimension_numbers<[1], [0], [0], [1], [0, 0, 1, 1], [], []>} : vector<1x32xbf16>, vector<32x32xbf16>, vector<1x32xf32> -> vector<1x32xf32>
    %c0_33 = arith.constant 0 : index
    %c0_34 = arith.constant 0 : index
    %60 = vector.load %arg10[%c0_33, %c0_34] : memref<1x32xf32, #tpu.memory_space<vmem>>, vector<1x32xf32>
    %61 = arith.addf %59, %60 : vector<1x32xf32>
    %c0_35 = arith.constant 0 : index
    %c0_36 = arith.constant 0 : index
    %c0_37 = arith.constant 0 : index
    %62 = vector.load %arg11[%c0_35, %c0_36, %c0_37] : memref<1x1x32xf32, #tpu.memory_space<vmem>>, vector<1x1x32xf32>
    %63 = vector.shape_cast %62 : vector<1x1x32xf32> to vector<1x32xf32>
    %64 = vector.shape_cast %61 : vector<1x32xf32> to vector<1x1x32xf32>
    tpu.vector_store %arg11[%c0_35, %c0_36, %c0_37], %64 {strides = array<i32>} : memref<1x1x32xf32, #tpu.memory_space<vmem>>, vector<1x1x32xf32>,
    return
  }
  func.func @transform_0(%arg0: i32) -> (i32, i32, i32) {
    %c0_i32 = arith.constant 0 : i32
    %c0_i32_0 = arith.constant 0 : i32
    %c0_i32_1 = arith.constant 0 : i32
    return %arg0, %c0_i32, %c0_i32_0 : i32, i32, i32
  }
  func.func @transform_1(%arg0: i32) -> (i32, i32) {
    %c0_i32 = arith.constant 0 : i32
    %c0_i32_0 = arith.constant 0 : i32
    %c0_i32_1 = arith.constant 0 : i32
    return %c0_i32, %c0_i32_0 : i32, i32
  }
  func.func @transform_2(%arg0: i32) -> (i32, i32) {
    %c0_i32 = arith.constant 0 : i32
    %c0_i32_0 = arith.constant 0 : i32
    %c0_i32_1 = arith.constant 0 : i32
    return %c0_i32, %c0_i32_0 : i32, i32
  }
  func.func @transform_3(%arg0: i32) -> (i32, i32) {
    %c0_i32 = arith.constant 0 : i32
    %c0_i32_0 = arith.constant 0 : i32
    %c0_i32_1 = arith.constant 0 : i32
    return %c0_i32, %c0_i32_0 : i32, i32
  }
  func.func @transform_4(%arg0: i32) -> (i32, i32) {
    %c0_i32 = arith.constant 0 : i32
    %c0_i32_0 = arith.constant 0 : i32
    %c0_i32_1 = arith.constant 0 : i32
    return %c0_i32, %c0_i32_0 : i32, i32
  }
  func.func @transform_5(%arg0: i32) -> (i32, i32) {
    %c0_i32 = arith.constant 0 : i32
    %c0_i32_0 = arith.constant 0 : i32
    %c0_i32_1 = arith.constant 0 : i32
    return %c0_i32, %c0_i32_0 : i32, i32
  }
  func.func @transform_6(%arg0: i32) -> (i32, i32) {
    %c0_i32 = arith.constant 0 : i32
    %c0_i32_0 = arith.constant 0 : i32
    %c0_i32_1 = arith.constant 0 : i32
    return %c0_i32, %c0_i32_0 : i32, i32
  }
  func.func @transform_7(%arg0: i32) -> (i32, i32) {
    %c0_i32 = arith.constant 0 : i32
    %c0_i32_0 = arith.constant 0 : i32
    %c0_i32_1 = arith.constant 0 : i32
    return %c0_i32, %c0_i32_0 : i32, i32
  }
  func.func @transform_8(%arg0: i32) -> (i32, i32) {
    %c0_i32 = arith.constant 0 : i32
    %c0_i32_0 = arith.constant 0 : i32
    %c0_i32_1 = arith.constant 0 : i32
    return %c0_i32, %c0_i32_0 : i32, i32
  }
  func.func @transform_9(%arg0: i32) -> (i32, i32) {
    %c0_i32 = arith.constant 0 : i32
    %c0_i32_0 = arith.constant 0 : i32
    %c0_i32_1 = arith.constant 0 : i32
    return %c0_i32, %c0_i32_0 : i32, i32
  }
  func.func @transform_10(%arg0: i32) -> (i32, i32, i32) {
    %c0_i32 = arith.constant 0 : i32
    %c0_i32_0 = arith.constant 0 : i32
    %c0_i32_1 = arith.constant 0 : i32
    return %arg0, %c0_i32, %c0_i32_0 : i32, i32, i32
  }
}

module attributes {stable_mosaic.version = 11 : i64} {
  func.func @attention_pool_kernel(%arg0: i32, %arg1: memref<1x32x16xf32, #tpu.memory_space<vmem>>, %arg2: memref<16x32xf32, #tpu.memory_space<vmem>>, %arg3: memref<16x32xf32, #tpu.memory_space<vmem>>, %arg4: memref<32x96xbf16, #tpu.memory_space<vmem>>, %arg5: memref<1x96xf32, #tpu.memory_space<vmem>>, %arg6: memref<32x32xbf16, #tpu.memory_space<vmem>>, %arg7: memref<32x32xbf16, #tpu.memory_space<vmem>>, %arg8: memref<32x32xbf16, #tpu.memory_space<vmem>>, %arg9: memref<32x32xbf16, #tpu.memory_space<vmem>>, %arg10: memref<1x32xf32, #tpu.memory_space<vmem>>, %arg11: memref<1x1x32xf32, #tpu.memory_space<vmem>>, %arg12: memref<16x32xbf16, #tpu.memory_space<vmem>>) attributes {dimension_semantics = [#tpu.dimension_semantics<parallel>], iteration_bounds = array<i64: 2>, scalar_prefetch = 0 : i64, scratch_operands = 1 : i64, tpu.core_type = #tpu.core_type<tc>, window_params = [{transform_indices = @transform_0, window_bounds = array<i64: 1, 32, 16>}, {pipeline_mode = #tpu.pipeline_mode<synchronous>, transform_indices = @transform_1, window_bounds = array<i64: 16, 32>}, {pipeline_mode = #tpu.pipeline_mode<synchronous>, transform_indices = @transform_2, window_bounds = array<i64: 16, 32>}, {pipeline_mode = #tpu.pipeline_mode<synchronous>, transform_indices = @transform_3, window_bounds = array<i64: 32, 96>}, {pipeline_mode = #tpu.pipeline_mode<synchronous>, transform_indices = @transform_4, window_bounds = array<i64: 1, 96>}, {pipeline_mode = #tpu.pipeline_mode<synchronous>, transform_indices = @transform_5, window_bounds = array<i64: 32, 32>}, {pipeline_mode = #tpu.pipeline_mode<synchronous>, transform_indices = @transform_6, window_bounds = array<i64: 32, 32>}, {pipeline_mode = #tpu.pipeline_mode<synchronous>, transform_indices = @transform_7, window_bounds = array<i64: 32, 32>}, {pipeline_mode = #tpu.pipeline_mode<synchronous>, transform_indices = @transform_8, window_bounds = array<i64: 32, 32>}, {pipeline_mode = #tpu.pipeline_mode<synchronous>, transform_indices = @transform_9, window_bounds = array<i64: 1, 32>}, {transform_indices = @transform_10, window_bounds = array<i64: 1, 1, 32>}]} {
    %c0 = arith.constant 0 : index
    %c0_0 = arith.constant 0 : index
    %c0_1 = arith.constant 0 : index
    %0 = vector.load %arg1[%c0, %c0_0, %c0_1] : memref<1x32x16xf32, #tpu.memory_space<vmem>>, vector<1x32x16xf32>
    %cst = arith.constant dense<0.000000e+00> : vector<1x32xf32>
    %1 = vector.multi_reduction <add>, %0, %cst [2] : vector<1x32x16xf32> to vector<1x32xf32>
    %cst_2 = arith.constant 1.600000e+01 : f32
    %2 = vector.broadcast %cst_2 : f32 to vector<1x32xf32>
    %3 = arith.divf %1, %2 : vector<1x32xf32>
    %4 = vector.shape_cast %0 : vector<1x32x16xf32> to vector<32x16xf32>
    %5 = tpu.transpose %4, [1, 0] : vector<32x16xf32> -> vector<16x32xf32>
    %6 = arith.truncf %5 : vector<16x32xf32> to vector<16x32xbf16>
    %c0_3 = arith.constant 0 : index
    %c0_4 = arith.constant 0 : index
    %7 = vector.load %arg12[%c0_3, %c0_4] : memref<16x32xbf16, #tpu.memory_space<vmem>>, vector<16x32xbf16>
    tpu.vector_store %arg12[%c0_3, %c0_4], %6 {strides = array<i32>} : memref<16x32xbf16, #tpu.memory_space<vmem>>, vector<16x32xbf16>,
    %c0_5 = arith.constant 0 : index
    %c0_6 = arith.constant 0 : index
    %8 = vector.load %arg12[%c0_5, %c0_6] : memref<16x32xbf16, #tpu.memory_space<vmem>>, vector<16x32xbf16>
    %9 = arith.truncf %3 : vector<1x32xf32> to vector<1x32xbf16>
    %c0_7 = arith.constant 0 : index
    %c0_8 = arith.constant 0 : index
    %10 = vector.load %arg4[%c0_7, %c0_8] : memref<32x96xbf16, #tpu.memory_space<vmem>>, vector<32x96xbf16>
    %cst_9 = arith.constant dense<0.000000e+00> : vector<1x96xf32>
    %11 = tpu.matmul %9, %10, %cst_9 {dimension_numbers = #tpu.dot_dimension_numbers<[1], [0], [0], [1], [0, 0, 1, 1], [], []>} : vector<1x32xbf16>, vector<32x96xbf16>, vector<1x96xf32> -> vector<1x96xf32>
    %c0_10 = arith.constant 0 : index
    %c0_11 = arith.constant 0 : index
    %12 = vector.load %arg5[%c0_10, %c0_11] : memref<1x96xf32, #tpu.memory_space<vmem>>, vector<1x96xf32>
    %13 = arith.addf %11, %12 : vector<1x96xf32>
    %14 = vector.extract_strided_slice %13 {offsets = [0, 0], sizes = [1, 32], strides = [1, 1]} : vector<1x96xf32> to vector<1x32xf32>
    %cst_12 = arith.constant 0.353553385 : f32
    %15 = vector.broadcast %cst_12 : f32 to vector<1x32xf32>
    %16 = arith.mulf %14, %15 : vector<1x32xf32>
    %17 = vector.extract_strided_slice %13 {offsets = [0, 32], sizes = [1, 32], strides = [1, 1]} : vector<1x96xf32> to vector<1x32xf32>
    %18 = vector.extract_strided_slice %13 {offsets = [0, 64], sizes = [1, 32], strides = [1, 1]} : vector<1x96xf32> to vector<1x32xf32>
    %c0_13 = arith.constant 0 : index
    %c0_14 = arith.constant 0 : index
    %19 = vector.load %arg6[%c0_13, %c0_14] : memref<32x32xbf16, #tpu.memory_space<vmem>>, vector<32x32xbf16>
    %cst_15 = arith.constant dense<0.000000e+00> : vector<16x32xf32>
    %20 = tpu.matmul %8, %19, %cst_15 {dimension_numbers = #tpu.dot_dimension_numbers<[1], [0], [0], [1], [0, 0, 1, 1], [], []>} : vector<16x32xbf16>, vector<32x32xbf16>, vector<16x32xf32> -> vector<16x32xf32>
    %21 = vector.shape_cast %20 : vector<16x32xf32> to vector<1x16x32xf32>
    %c0_16 = arith.constant 0 : index
    %c0_17 = arith.constant 0 : index
    %22 = vector.load %arg2[%c0_16, %c0_17] : memref<16x32xf32, #tpu.memory_space<vmem>>, vector<16x32xf32>
    %23 = vector.shape_cast %22 : vector<16x32xf32> to vector<1x16x32xf32>
    %24 = arith.addf %21, %23 : vector<1x16x32xf32>
    %c0_18 = arith.constant 0 : index
    %c0_19 = arith.constant 0 : index
    %25 = vector.load %arg8[%c0_18, %c0_19] : memref<32x32xbf16, #tpu.memory_space<vmem>>, vector<32x32xbf16>
    %26 = vector.shape_cast %16 : vector<1x32xf32> to vector<1x1x32xf32>
    %27 = vector.broadcast %26 : vector<1x1x32xf32> to vector<1x16x32xf32>
    %28 = arith.mulf %27, %24 : vector<1x16x32xf32>
    %29 = vector.shape_cast %28 : vector<1x16x32xf32> to vector<16x32xf32>
    %30 = arith.truncf %29 : vector<16x32xf32> to vector<16x32xbf16>
    %cst_20 = arith.constant dense<0.000000e+00> : vector<16x32xf32>
    %31 = tpu.matmul %30, %25, %cst_20 {dimension_numbers = #tpu.dot_dimension_numbers<[1], [0], [0], [1], [0, 0, 1, 1], [], []>} : vector<16x32xbf16>, vector<32x32xbf16>, vector<16x32xf32> -> vector<16x32xf32>
    %32 = vector.shape_cast %31 : vector<16x32xf32> to vector<1x16x32xf32>
    %33 = arith.mulf %16, %17 : vector<1x32xf32>
    %34 = arith.truncf %33 : vector<1x32xf32> to vector<1x32xbf16>
    %cst_21 = arith.constant dense<0.000000e+00> : vector<1x32xf32>
    %35 = tpu.matmul %34, %25, %cst_21 {dimension_numbers = #tpu.dot_dimension_numbers<[1], [0], [0], [1], [0, 0, 1, 1], [], []>} : vector<1x32xbf16>, vector<32x32xbf16>, vector<1x32xf32> -> vector<1x32xf32>
    %cst_22 = arith.constant dense<0xFF800000> : vector<1x32xf32>
    %36 = vector.multi_reduction <maximumf>, %32, %cst_22 [1] : vector<1x16x32xf32> to vector<1x32xf32>
    %37 = arith.maximumf %36, %35 : vector<1x32xf32>
    %38 = vector.shape_cast %37 : vector<1x32xf32> to vector<1x1x32xf32>
    %39 = vector.broadcast %38 : vector<1x1x32xf32> to vector<1x16x32xf32>
    %40 = arith.subf %32, %39 : vector<1x16x32xf32>
    %41 = math.exp %40 : vector<1x16x32xf32>
    %42 = arith.subf %35, %37 : vector<1x32xf32>
    %43 = math.exp %42 : vector<1x32xf32>
    %cst_23 = arith.constant dense<0.000000e+00> : vector<1x32xf32>
    %44 = vector.multi_reduction <add>, %41, %cst_23 [1] : vector<1x16x32xf32> to vector<1x32xf32>
    %45 = arith.addf %43, %44 : vector<1x32xf32>
    %c0_24 = arith.constant 0 : index
    %c0_25 = arith.constant 0 : index
    %46 = vector.load %arg7[%c0_24, %c0_25] : memref<32x32xbf16, #tpu.memory_space<vmem>>, vector<32x32xbf16>
    %cst_26 = arith.constant dense<0.000000e+00> : vector<16x32xf32>
    %47 = tpu.matmul %8, %46, %cst_26 {dimension_numbers = #tpu.dot_dimension_numbers<[1], [0], [0], [1], [0, 0, 1, 1], [], []>} : vector<16x32xbf16>, vector<32x32xbf16>, vector<16x32xf32> -> vector<16x32xf32>
    %48 = vector.shape_cast %47 : vector<16x32xf32> to vector<1x16x32xf32>
    %c0_27 = arith.constant 0 : index
    %c0_28 = arith.constant 0 : index
    %49 = vector.load %arg3[%c0_27, %c0_28] : memref<16x32xf32, #tpu.memory_space<vmem>>, vector<16x32xf32>
    %50 = vector.shape_cast %49 : vector<16x32xf32> to vector<1x16x32xf32>
    %51 = arith.addf %48, %50 : vector<1x16x32xf32>
    %52 = arith.mulf %43, %18 : vector<1x32xf32>
    %53 = arith.mulf %41, %51 : vector<1x16x32xf32>
    %cst_29 = arith.constant dense<0.000000e+00> : vector<1x32xf32>
    %54 = vector.multi_reduction <add>, %53, %cst_29 [1] : vector<1x16x32xf32> to vector<1x32xf32>
    %55 = arith.addf %52, %54 : vector<1x32xf32>
    %56 = arith.divf %55, %45 : vector<1x32xf32>
    %57 = arith.truncf %56 : vector<1x32xf32> to vector<1x32xbf16>
    %c0_30 = arith.constant 0 : index
    %c0_31 = arith.constant 0 : index
    %58 = vector.load %arg9[%c0_30, %c0_31] : memref<32x32xbf16, #tpu.memory_space<vmem>>, vector<32x32xbf16>
    %cst_32 = arith.constant dense<0.000000e+00> : vector<1x32xf32>
    %59 = tpu.matmul %57, %58, %cst_32 {dimension_numbers = #tpu.dot_dimension_numbers<[1], [0], [0], [1], [0, 0, 1, 1], [], []>} : vector<1x32xbf16>, vector<32x32xbf16>, vector<1x32xf32> -> vector<1x32xf32>
    %c0_33 = arith.constant 0 : index
    %c0_34 = arith.constant 0 : index
    %60 = vector.load %arg10[%c0_33, %c0_34] : memref<1x32xf32, #tpu.memory_space<vmem>>, vector<1x32xf32>
    %61 = arith.addf %59, %60 : vector<1x32xf32>
    %c0_35 = arith.constant 0 : index
    %c0_36 = arith.constant 0 : index
    %c0_37 = arith.constant 0 : index
    %62 = vector.load %arg11[%c0_35, %c0_36, %c0_37] : memref<1x1x32xf32, #tpu.memory_space<vmem>>, vector<1x1x32xf32>
    %63 = vector.shape_cast %62 : vector<1x1x32xf32> to vector<1x32xf32>
    %64 = vector.shape_cast %61 : vector<1x32xf32> to vector<1x1x32xf32>
    tpu.vector_store %arg11[%c0_35, %c0_36, %c0_37], %64 {strides = array<i32>} : memref<1x1x32xf32, #tpu.memory_space<vmem>>, vector<1x1x32xf32>,
    return
  }
  func.func @transform_0(%arg0: i32) -> (i32, i32, i32) {
    %c0_i32 = arith.constant 0 : i32
    %c0_i32_0 = arith.constant 0 : i32
    %c0_i32_1 = arith.constant 0 : i32
    return %arg0, %c0_i32, %c0_i32_0 : i32, i32, i32
  }
  func.func @transform_1(%arg0: i32) -> (i32, i32) {
    %c0_i32 = arith.constant 0 : i32
    %c0_i32_0 = arith.constant 0 : i32
    %c0_i32_1 = arith.constant 0 : i32
    return %c0_i32, %c0_i32_0 : i32, i32
  }
  func.func @transform_2(%arg0: i32) -> (i32, i32) {
    %c0_i32 = arith.constant 0 : i32
    %c0_i32_0 = arith.constant 0 : i32
    %c0_i32_1 = arith.constant 0 : i32
    return %c0_i32, %c0_i32_0 : i32, i32
  }
  func.func @transform_3(%arg0: i32) -> (i32, i32) {
    %c0_i32 = arith.constant 0 : i32
    %c0_i32_0 = arith.constant 0 : i32
    %c0_i32_1 = arith.constant 0 : i32
    return %c0_i32, %c0_i32_0 : i32, i32
  }
  func.func @transform_4(%arg0: i32) -> (i32, i32) {
    %c0_i32 = arith.constant 0 : i32
    %c0_i32_0 = arith.constant 0 : i32
    %c0_i32_1 = arith.constant 0 : i32
    return %c0_i32, %c0_i32_0 : i32, i32
  }
  func.func @transform_5(%arg0: i32) -> (i32, i32) {
    %c0_i32 = arith.constant 0 : i32
    %c0_i32_0 = arith.constant 0 : i32
    %c0_i32_1 = arith.constant 0 : i32
    return %c0_i32, %c0_i32_0 : i32, i32
  }
  func.func @transform_6(%arg0: i32) -> (i32, i32) {
    %c0_i32 = arith.constant 0 : i32
    %c0_i32_0 = arith.constant 0 : i32
    %c0_i32_1 = arith.constant 0 : i32
    return %c0_i32, %c0_i32_0 : i32, i32
  }
  func.func @transform_7(%arg0: i32) -> (i32, i32) {
    %c0_i32 = arith.constant 0 : i32
    %c0_i32_0 = arith.constant 0 : i32
    %c0_i32_1 = arith.constant 0 : i32
    return %c0_i32, %c0_i32_0 : i32, i32
  }
  func.func @transform_8(%arg0: i32) -> (i32, i32) {
    %c0_i32 = arith.constant 0 : i32
    %c0_i32_0 = arith.constant 0 : i32
    %c0_i32_1 = arith.constant 0 : i32
    return %c0_i32, %c0_i32_0 : i32, i32
  }
  func.func @transform_9(%arg0: i32) -> (i32, i32) {
    %c0_i32 = arith.constant 0 : i32
    %c0_i32_0 = arith.constant 0 : i32
    %c0_i32_1 = arith.constant 0 : i32
    return %c0_i32, %c0_i32_0 : i32, i32
  }
  func.func @transform_10(%arg0: i32) -> (i32, i32, i32) {
    %c0_i32 = arith.constant 0 : i32
    %c0_i32_0 = arith.constant 0 : i32
    %c0_i32_1 = arith.constant 0 : i32
    return %arg0, %c0_i32, %c0_i32_0 : i32, i32, i32
  }
}

</mosaic_0001>

<bundles_post_ra>
// kernel: tpu_custom_call.1
= control target key start
LH: loop header
LB: loop body
LE: loop exit
PB: predicated region body
PF: predicated region fallthrough
CT: control target
= control target key end

     0   :  { %15 = vsyncpa [#allocation4], 0  ;;  %s1405_s0 = inlined_call_operand.vmem [shape: f32[2,32,16], index: 0, kind: input, shape index: {}]   ;;  %s1406_s1 = inlined_call_operand.vmem [shape: f32[16,32], index: 1, kind: input, shape index: {}]   ;;  %s1407_s2 = inlined_call_operand.vmem [shape: f32[16,32], index: 2, kind: input, shape index: {}]   ;;  %s1408_s3 = inlined_call_operand.vmem [shape: bf16[32,96], index: 3, kind: input, shape index: {}]   ;;  %s1409_s4 = inlined_call_operand.vmem [shape: f32[1,96], index: 4, kind: input, shape index: {}]   ;;  %s1410_s5 = inlined_call_operand.vmem [shape: bf16[32,32], index: 5, kind: input, shape index: {}]   ;;  %s1411_s6 = inlined_call_operand.vmem [shape: bf16[32,32], index: 6, kind: input, shape index: {}]   ;;  %s1412_s7 = inlined_call_operand.vmem [shape: bf16[32,32], index: 7, kind: input, shape index: {}]   ;;  %s1413_s8 = inlined_call_operand.vmem [shape: bf16[32,32], index: 8, kind: input, shape index: {}]   ;;  %s1414_s9 = inlined_call_operand.vmem [shape: f32[1,32], index: 9, kind: input, shape index: {}]   ;;  %s1415_s10 = inlined_call_operand.hbm [shape: f32[2,1,32], index: 10, kind: output, shape index: {}]  }
   0x1   :  { %17 = vsyncpa [#allocation4 + $0x1], 0  ;;  %s1213_s13 = smov 0   ;;  %s1215_s14 = smov 0  }
   0x2   :  { %s1217_s15 = smov 0   ;;  %s1219_s16 = smov 0  }
   0x3 LB: > { %s1234_s17 = sadd.s32 4294967295, %s1151_s16   ;;  %s936_s18 = sadd.s32 4294967294, %s1151_s16   ;;  %s1151_s16 = sphi %s1219_s16, %s1421_s16   ;;  %s1147_s15 = sphi %s1217_s15, %s1420_s15   ;;  %s1143_s14 = sphi %s1215_s14, %s1419_s14   ;;  %s1139_s13 = sphi %s1213_s13, %s1418_s13  }
   0x4   : > { %s1238_s19 = sadd.s32 1, %s1151_s16   ;;  %s245_s20 = sadd.s32 1, %s1147_s15 }
   0x5   : > { %s242_s21 = ssub.s32 %s1151_s16, %s1238_s19  ;;  %p255_p0 = scmp.ne.s32.totalorder %s1147_s15, %s1143_s14 }
   0x6   : > { %p243_p1 = scmp.eq.s32.totalorder %s242_s21, 0  ;;  %p256_p2 = scmp.eq.s32.totalorder %s1234_s17, 1 }
   0x7   : > { %p261_p3 = scmp.ne.s32.totalorder %s1143_s14, %s1139_s13  ;;  %p262_p4 = scmp.eq.s32.totalorder %s936_s18, 1 }
   0x8   : > { %s1249_s22 = scalar_select %p243_p1, %s1147_s15, %s245_s20  }
   0x9   : > { %p1251_p5 = por %p256_p2, %p255_p0  ;;  %p1255_p6 = por %p262_p4, %p261_p3 }
   0xa   : > { %p939_p7 = scmp.ge.s32.totalorder %s1151_s16, 1  ;;  %p315_p8 = scmp.lt.s32.totalorder %s1151_s16, 3 }
   0xc   : > { %p316_p9 = pnand %p939_p7, %p315_p8 }
   0xd   : > { %p352_p10 = scmp.lt.s32.totalorder (!%p316_p9), %s1234_s17, 1  ;;  %vm362_vm0 = vcmask (!%p316_p9), 130048   ;;  %v1071_v8 = vld [vmem:[%s1408_s3] sm:$0xff] (!%p316_p9)   ;;  %v1153_v9 = vmov (!%p316_p9), 0.0   ;;  %v1072_v10 = vld [vmem:[%s1408_s3 + $0x8] sm:$0xff] (!%p316_p9)   ;;  %vm1154_vm1 = vmmov (!%p316_p9), 0   ;;  %v429_v13 = vlaneseq (!%p316_p9) }
   0xe   : > { %319 = sbr.rel (%p316_p9) target bundleno = 1011 (0x3f3), region = 60  ;;  %980 = vmatprep.subr.bf16.mxu0 (!%p316_p9), %v1153_v9  ;;  %988 = vmatprep.subr.bf16.mxu1 (!%p316_p9), %v1153_v9  ;;  %v1073_v11 = vld [vmem:[%s1410_s5] sm:$0xff] (!%p316_p9)   ;;  %v1074_v12 = vld [vmem:[%s1410_s5 + $0x8] sm:$0xff] (!%p316_p9)   ;;  %vm440_vm2 = vcmask (!%p316_p9), 130112   ;;  %vm447_vm3 = vcmask (!%p316_p9), 195712   ;;  %vm454_vm4 = vcmask (!%p316_p9), 261312  }
   0xf   : > { %981 = vmatpush3.bf16.msra.mxu0 (!%p316_p9), %v1071_v8  ;;  %984 = vmatprep.mubr.msk.bf16.mxu0 (!%p316_p9), %vm1154_vm1, %v1153_v9  ;;  %v430_v14 = vand.u32 (!%p316_p9), 127, %v429_v13  ;;  %v1288_v17 = vshrl.u32 (!%p316_p9), %v429_v13, 7  ;;  %vm413_vm5 = vcmask (!%p316_p9), 261120   ;;  %v1075_v49 = vld [vmem:[%s1412_s7] sm:$0xff] (!%p316_p9)   ;;  %v1076_v50 = vld [vmem:[%s1412_s7 + $0x8] sm:$0xff] (!%p316_p9)   ;;  %s1155_s18 = smov (!%p316_p9), 96  }
  0x10   : > { %982 = vmatprep.subr.bf16.mxu0 (!%p316_p9), %v1153_v9  ;;  %992 = vmatprep.mubr.msk.bf16.mxu1 (!%p316_p9), %vm1154_vm1, %v1153_v9  ;;  %v422_v51 = vld [vmem:[%s1409_s4] sm:$0x1] (!%p316_p9)  ;;  %s1156_s20 = smov (!%p316_p9), 64   ;;  %v574_v61 = vld [vmem:[%s1406_s1 + $0x8] sm:$0xff] (!%p316_p9)  ;;  %s958_s12 = sshll.u32 (!%p316_p9), %s1234_s17, 4  ;;  %vm866_vm6 = vcmask (!%p316_p9), 253952  }
  0x11   : > { %989 = vmatpush3.bf16.msra.mxu1 (!%p316_p9), %v1073_v11  ;;  %v442_v18 = vadd.s32 (!%p316_p9), 4294967280, %v430_v14  ;;  %v435_v19 = vadd.s32 (!%p316_p9), 4294967288, %v430_v14  ;;  %v449_v20 = vadd.s32 (!%p316_p9), 4294967272, %v430_v14  ;;  %v433_v29 = vsub.s32 (!%p316_p9), %v430_v14, %v1288_v17  ;;  %v573_v57 = vld [vmem:[%s1406_s1] sm:$0xff] (!%p316_p9)  ;;  %v1078_v8 = vld [vmem:[%s1411_s6 + $0x8] sm:$0xff] (!%p316_p9)   ;;  %s1157_s28 = smov (!%p316_p9), [#allocation3]  }
  0x12   : > { %990 = vmatprep.subr.bf16.mxu1 (!%p316_p9), %v1153_v9  ;;  %v583_v59 = vsub.s32 (!%p316_p9), 0, %v1288_v17  ;;  %v1079_v13 = vld [vmem:[%s1413_s8] sm:$0xff] (!%p316_p9)   ;;  %v1080_v14 = vld [vmem:[%s1413_s8 + $0x8] sm:$0xff] (!%p316_p9)   ;;  %s1093_s30 = sshll.u32 (!%p316_p9), %s1157_s28, 4  ;;  %s1094_s30 = int_to_ptr.vmem [resolvable:$false] %s1093_s30 }
  0x13   : > { %983 = vmatpush3.bf16.msra.mxu0 (!%p316_p9), %v1072_v10  ;;  %v445_v27 = vsub.s32 (!%p316_p9), %v442_v18, %v1288_v17  ;;  %v438_v30 = vsub.s32 (!%p316_p9), %v435_v19, %v1288_v17  ;;  %v452_v32 = vsub.s32 (!%p316_p9), %v449_v20, %v1288_v17  ;;  %s1095_s11 = scalar_lea.vmem (!%p316_p9), %s1094_s30, 32 }
  0x14   : > { %996 = vmatprep.subr.bf16.mxu0 (!%p316_p9), %v1153_v9 }
  0x15   : > { %s353_s25 = scalar_select %p352_p10, %s1234_s17, 1  ;;  %991 = vmatpush3.bf16.msra.mxu1 %v1074_v12 }
  0x16   : > { %1004 = vmatprep.subr.bf16.mxu1 %v1153_v9 }
  0x17   : > { %s961_s26 = sshll.u32 %s353_s25, 5 }
  0x18   : > { %s356_s29 = scalar_lea.vmem %s1405_s0, %s961_s26  ;;  %s1363_s26 = scalar_lea.hbm %s1415_s10, %s958_s12 }
  0x19   : > { %v360_v0 = vld [vmem:[%s356_s29 + $0x10] sm:$0xff]  ;;  %v358_v1 = vld [vmem:[%s356_s29] sm:$0xff]  ;;  %v361_v2 = vld [vmem:[%s356_s29 + $0x18] sm:$0xff] }
  0x1a   : > { %v369_v3 = vsel %vm362_vm0, %v360_v0, 0.0  ;;  %v363_v4 = vsel %vm362_vm0, %v358_v1, 0.0  ;;  %v359_v5 = vld [vmem:[%s356_s29 + $0x8] sm:$0xff]  ;;  %v372_v6 = vsel %vm362_vm0, %v361_v2, 0.0  ;;  %s350_s29 = sand.u32 1, %s1143_s14  }
  0x1b   : > { %370 = vadd.xlane.f32.xlu1 %v369_v3  ;;  %364 = vadd.xlane.f32.xlu0 %v363_v4  ;;  %v366_v7 = vsel %vm362_vm0, %v359_v5, 0.0  ;;  %s869_s17 = scalar_lea.sflag [#allocation4], %s350_s29 }
  0x1f   : > { %373 = vadd.xlane.f32.xlu1 %v372_v6  ;;  %367 = vadd.xlane.f32.xlu0 %v366_v7  ;;  %v1077_v6 = vld [vmem:[%s1411_s6] sm:$0xff]  }
  0x4c   : > { %380 = vxpose.xlu0.b32.start [1/4] (short) (narrow) %v358_v1, 16 }
  0x50   : > { %381 = vxpose.xlu0.b32.cont [2/4] (short) (narrow) %v359_v5, 16 }
  0x54   : > { %382 = vxpose.xlu0.b32.cont [3/4] (short) (narrow) %v360_v0, 16 }
  0x58   : > { %383 = vxpose.xlu0.b32.end [4/4] (short) (narrow) %v361_v2, 16 }
  0xa8   : > { %v371_v15 = vpop.xlane.xlu1 %370  ;;  %v365_v16 = vpop.xlane.xlu0 %364 }
  0xa9   : > { %v378_v23 = vmul.f32 0.0625, %v371_v15  ;;  %v376_v24 = vmul.f32 0.0625, %v365_v16 }
  0xac   : > { %v374_v21 = vpop.xlane.xlu1 %373  ;;  %v368_v22 = vpop.xlane.xlu0 %367 }
  0xad   : > { %v379_v25 = vmul.f32 0.0625, %v374_v21  ;;  %v377_v26 = vmul.f32 0.0625, %v368_v22 }
  0xaf   : > { %v417_v28 = vpack.c.bf16 %v379_v25, %v378_v23  ;;  %v416_v31 = vpack.c.bf16 %v377_v26, %v376_v24 }
  0xb1   : > { %v427_v33 = vunpack.c.l.b16 %v417_v28  ;;  %v428_v34 = vunpack.c.h.b16 %v417_v28  ;;  %v425_v35 = vunpack.c.l.b16 %v416_v31  ;;  %v426_v36 = vunpack.c.h.b16 %v416_v31 }
  0xb3   : > { %v446_v37 = vrot.slane %v427_v33, %v445_v27  ;;  %v434_v38 = vrot.slane %v425_v35, %v433_v29  ;;  %v439_v39 = vrot.slane %v426_v36, %v438_v30  ;;  %v453_v40 = vrot.slane %v428_v34, %v452_v32 }
  0xb5   : > { %v441_v41 = vsel %vm440_vm2, %v439_v39, %v434_v38 }
  0xb6   : > { %v448_v42 = vsel %vm447_vm3, %v446_v37, %v441_v41 }
  0xb7   : > { %v455_v43 = vsel %vm454_vm4, %v453_v40, %v448_v42  ;;  %v783_v42 = vld [vmem:[%s1407_s2] sm:$0xff] }
  0xb8   : > { %v456_v44 = vpack.c.b16 %v455_v43, %v455_v43  ;;  %v784_v43 = vld [vmem:[%s1407_s2 + $0x8] sm:$0xff] }
  0xba   : > { %985 = vmatmul.mubr.msk.bf16.vlgmr.msra.gmra.mrb[0].mxu0 %vm413_vm5, %v456_v44 }
  0xbb   : > { %1000 = vmatprep.mubr.msk.bf16.mxu0 %vm1154_vm1, %v1153_v9  ;;  %997 = vmatpush3.bf16.msra.mxu0 %v1075_v49 }
  0xbc   : > { %998 = vmatprep.subr.bf16.mxu0 %v1153_v9 }
  0xbf   : > { %999 = vmatpush3.bf16.msra.mxu0 %v1076_v50 }
  0xc0   : > { %1012 = vmatprep.subr.bf16.mxu0 %v1153_v9 }
  0xcc   : > { %v396_v45 = vpop.trf.xlu0 }
  0xd0   : > { %v397_v46 = vpop.trf.xlu0 }
  0xd1   : > { %v412_v47 = vpack.c.bf16 %v397_v46, %v396_v45 }
  0xd3   : > { %414 = vst.msk [vmem:[#allocation2] sm:$0xff] %vm413_vm5, %v412_v47 }
  0xda   : > { %v415_v48 = vld [vmem:[#allocation2] sm:$0xff] }
  0xdb   : > { %993 = vmatmul.mubr.msk.bf16.vlgmr.msra.gmra.mrb[0].mxu1 %vm413_vm5, %v415_v48 }
  0xdc   : > { %1008 = vmatprep.mubr.msk.bf16.mxu1 %vm1154_vm1, %v1153_v9  ;;  %1005 = vmatpush3.bf16.msra.mxu1 %v1075_v49 }
  0xdd   : > { %1006 = vmatprep.subr.bf16.mxu1 %v1153_v9 }
  0xe0   : > { %1007 = vmatpush3.bf16.msra.mxu1 %v1076_v50 }
  0xe1   : > { %1020 = vmatprep.subr.bf16.mxu1 %v1153_v9 }
 0x18d   : > { %v506_v52 = vpop.f32.mrb[0].mxu0 }
 0x18e   : > { %v507_v53 = vadd.f32 %v506_v52, %v422_v51  ;;  %v986_v54 = vpop.f32.mrb[1].mxu0 }
 0x18f   : > { %v509_v55 = vpop.f32.mrb[2].mxu0 }
 0x190   : > { %645 = vrot.lane.b32.xlu1 %v507_v53, %s1155_s18  ;;  %v987_v56 = vpop.f32.mrb[3].mxu0  ;;  %v512_v58 = vmul.f32 0.35355338, %v507_v53  ;;  %s351_s18 = scalar_lea.vmem [#allocation3], %s350_s29 }
 0x192   : > { %v584_v1 = vrot.slane %v512_v58, %v583_v59 }
 0x194   : > { %787 = vrot.lane.b32.xlu1 %v507_v53, %s1156_s20  ;;  %s881_s20 = sshll.u32 %s351_s18, 4  ;;  %s1365_s20 = int_to_ptr.vmem [resolvable:$true] %s881_s20 }
 0x195   : > { %s1089_s27 = scalar_lea.vmem %s1365_s20, 16  ;;  %p1096_p0 = scmp.lt.s32.totalorder %s1365_s20, %s1094_s30 }
 0x196   : > { %p1090_p11 = scmp.ne.s32.totalorder %s1365_s20, %s1089_s27  ;;  %p1097_p1 = scmp.lt.s32.totalorder %s1095_s11, %s1089_s27 }
 0x198   : > { %p1091_p12 = pnand %p1090_p11, %p1251_p5  ;;  %p1098_p2 = por %p1097_p1, %p1096_p0 }
 0x19a   : > { %p1092_p13 = pneg %p1091_p12 }
 0x19c   : > { %p1099_p3 = pnand %p1098_p2, %p1092_p13 }
 0x1ae   : > { %v566_v60 = vpop.f32.mrb[0].mxu1 }
 0x1af   : > { %v575_v62 = vadd.f32 %v573_v57, %v566_v60  ;;  %v994_v63 = vpop.f32.mrb[1].mxu1 }
 0x1b0   : > { %v569_v0 = vpop.f32.mrb[2].mxu1 }
 0x1b1   : > { %v576_v2 = vadd.f32 %v574_v61, %v569_v0  ;;  %v995_v3 = vpop.f32.mrb[3].mxu1  ;;  %v585_v4 = vmul.f32 %v584_v1, %v575_v62 }
 0x1b3   : > { %v586_v5 = vmul.f32 %v584_v1, %v576_v2 }
 0x1b5   : > { %v587_v7 = vpack.c.bf16 %v586_v5, %v585_v4 }
 0x1b7   : > { %1001 = vmatmul.mubr.msk.bf16.vlgmr.msra.gmra.mrb[4].mxu0 %vm413_vm5, %v587_v7 }
 0x1b8   : > { %1013 = vmatpush3.bf16.msra.mxu0 %v1077_v6  ;;  %1016 = vmatprep.mubr.msk.bf16.mxu0 %vm1154_vm1, %v1153_v9 }
 0x1b9   : > { %1014 = vmatprep.subr.bf16.mxu0 %v1153_v9 }
 0x1bc   : > { %1015 = vmatpush3.bf16.msra.mxu0 %v1078_v8 }
 0x1bf   : > { %1017 = vmatmul.mubr.msk.bf16.vlgmr.msra.gmra.mrb[8].mxu0 %vm413_vm5, %v415_v48 }
 0x202   : > { %v646_v10 = vpop.permute.xlu1 %645 }
 0x203   : > { %v648_v11 = vmul.f32 %v646_v10, %v512_v58 }
 0x205   : > { %v649_v12 = vpack.c.bf16 %v648_v11, %v648_v11 }
 0x206   : > { %v788_v5 = vpop.permute.xlu1 %787 }
 0x207   : > { %1009 = vmatmul.mubr.msk.bf16.vlgmr.msra.gmra.mrb[4].mxu1 %vm413_vm5, %v649_v12 }
 0x208   : > { %1024 = vmatprep.mubr.msk.bf16.mxu1 %vm1154_vm1, %v1153_v9  ;;  %1021 = vmatpush3.bf16.msra.mxu1 %v1079_v13 }
 0x209   : > { %1022 = vmatprep.subr.bf16.mxu1 %v1153_v9 }
 0x20c   : > { %1023 = vmatpush3.bf16.msra.mxu1 %v1080_v14  ;;  %v810_v14 = vld [vmem:[%s1414_s9] sm:$0x1] }
 0x28a   : > { %v637_v15 = vpop.f32.mrb[4].mxu0 }
 0x28b   : > { %v1002_v16 = vpop.f32.mrb[5].mxu0  ;;  %v693_v18 = vsel %vm413_vm5, %v637_v15, -inf }
 0x28c   : > { %v640_v17 = vpop.f32.mrb[6].mxu0 }
 0x28d   : > { %v694_v19 = vsel %vm413_vm5, %v640_v17, -inf  ;;  %v1003_v20 = vpop.f32.mrb[7].mxu0 }
 0x28e   : > { %v695_v21 = vmax.f32 %v693_v18, %v694_v19 }
 0x290   : > { %v696_v26 = vrot.slane %v695_v21, 4 }
 0x292   : > { %v776_v22 = vpop.f32.mrb[8].mxu0  ;;  %v697_v27 = vmax.f32 %v695_v21, %v696_v26 }
 0x293   : > { %v1018_v23 = vpop.f32.mrb[9].mxu0  ;;  %v785_v44 = vadd.f32 %v783_v42, %v776_v22 }
 0x294   : > { %v779_v24 = vpop.f32.mrb[10].mxu0  ;;  %v698_v28 = vrot.slane %v697_v27, 2 }
 0x295   : > { %v1019_v25 = vpop.f32.mrb[11].mxu0  ;;  %v786_v46 = vadd.f32 %v784_v43, %v779_v24 }
 0x296   : > { %v699_v29 = vmax.f32 %v697_v27, %v698_v28 }
 0x298   : > { %v700_v30 = vrot.slane %v699_v29, 1 }
 0x29a   : > { %v701_v9 = vmax.f32 %v699_v29, %v700_v30 }
 0x2da   : > { %v687_v31 = vpop.f32.mrb[4].mxu1 }
 0x2db   : > { %v702_v32 = vmax.f32 %v701_v9, %v687_v31  ;;  %v1010_v33 = vpop.f32.mrb[5].mxu1 }
 0x2dc   : > { %v690_v34 = vpop.f32.mrb[6].mxu1 }
 0x2dd   : > { %v706_v35 = vrot.slane %v702_v32, %v583_v59  ;;  %v713_v36 = vsub.f32 %v687_v31, %v702_v32  ;;  %v1011_v37 = vpop.f32.mrb[7].mxu1 }
 0x2df   : > { %v707_v38 = vsub.f32 %v637_v15, %v706_v35  ;;  %v708_v39 = vsub.f32 %v640_v17, %v706_v35  ;;  %v714_v47 = vmul.f32 1.442695, %v713_v36 }
 0x2e1   : > { %v709_v40 = vmul.f32 1.442695, %v707_v38  ;;  %v711_v41 = vmul.f32 1.442695, %v708_v39 }
 0x2e3   : > { %1081 = vpow2.f32 %v709_v40 }
 0x2e4   : > { %1083 = vpow2.f32 %v711_v41 }
 0x2e5   : > { %1085 = vpow2.f32 %v714_v47 }
 0x2ed   : > { %v1082_v45 = vpop.eup %1081 }
 0x2ee   : > { %v1084_v48 = vpop.eup %1083  ;;  %v716_v49 = vsel %vm413_vm5, %v1082_v45, 0.0  ;;  %v791_v50 = vmul.f32 %v1082_v45, %v785_v44 }
 0x2ef   : > { %v717_v51 = vsel %vm413_vm5, %v1084_v48, 0.0  ;;  %v792_v52 = vmul.f32 %v1084_v48, %v786_v46  ;;  %v1086_v2 = vpop.eup %1085 }
 0x2f0   : > { %v718_v53 = vadd.f32 %v717_v51, %v716_v49  ;;  %v793_v54 = vsel %vm413_vm5, %v791_v50, 0.0  ;;  %v790_v7 = vmul.f32 %v1086_v2, %v788_v5 }
 0x2f1   : > { %v794_v55 = vsel %vm413_vm5, %v792_v52, 0.0 }
 0x2f2   : > { %v719_v56 = vrot.slane %v718_v53, 4  ;;  %v795_v57 = vadd.f32 %v794_v55, %v793_v54 }
 0x2f4   : > { %v720_v58 = vadd.f32 %v719_v56, %v718_v53  ;;  %v796_v59 = vrot.slane %v795_v57, 4 }
 0x2f6   : > { %v721_v60 = vrot.slane %v720_v58, 2  ;;  %v797_v61 = vadd.f32 %v796_v59, %v795_v57 }
 0x2f8   : > { %v722_v62 = vadd.f32 %v721_v60, %v720_v58  ;;  %v798_v63 = vrot.slane %v797_v61, 2 }
 0x2fa   : > { %v723_v0 = vrot.slane %v722_v62, 1  ;;  %v799_v1 = vadd.f32 %v798_v63, %v797_v61 }
 0x2fc   : > { %v724_v3 = vadd.f32 %v723_v0, %v722_v62  ;;  %v800_v4 = vrot.slane %v799_v1, 1 }
 0x2fe   : > { %v725_v6 = vadd.f32 %v1086_v2, %v724_v3  ;;  %v801_v8 = vadd.f32 %v800_v4, %v799_v1 }
 0x300   : > { %1087 = vrcp.f32 %v725_v6  ;;  %v802_v10 = vadd.f32 %v801_v8, %v790_v7 }
 0x30a   : > { %v1088_v11 = vpop.eup %1087 }
 0x30b   : > { %v804_v12 = vmul.f32 %v1088_v11, %v802_v10 }
 0x30d   : > { %v805_v13 = vpack.c.bf16 %v804_v12, %v804_v12 }
 0x30f   : > { %1025 = vmatmul.mubr.msk.bf16.vlgmr.msra.gmra.mrb[8].mxu1 %vm413_vm5, %v805_v13 }
 0x3e2   : > { %v860_v15 = vpop.f32.mrb[8].mxu1 }
 0x3e3   : > { %v861_v16 = vadd.f32 %v860_v15, %v810_v14  ;;  %v1026_v17 = vpop.f32.mrb[9].mxu1 }
 0x3e4   : > { %v863_v18 = vpop.f32.mrb[10].mxu1 }
 0x3e5   : > { %v1027_v19 = vpop.f32.mrb[11].mxu1  ;;  %867 = vst.msk [vmem:[%s351_s18] sm:$0x1] %vm866_vm6, %v861_v16 }
 0x3e6   : > { %1102 = shalt.err (!%p1099_p3)
}
 0x3e7   : > { %s1103_s29 = scalar_lea.hbm %s1363_s26, 16  ;;  %s1107_s21 = scalar_lea.hbm %s1415_s10, 32 }
 0x3e8   : > { %p1104_p4 = scmp.ne.s32.totalorder %s1363_s26, %s1103_s29  ;;  %p1108_p9 = scmp.lt.u32.totalorder %s1363_s26, %s1415_s10 }
 0x3e9   : > { %p1109_p10 = scmp.lt.u32.totalorder %s1107_s21, %s1103_s29  ;;  %p1111_p12 = scmp.lt.u32.totalorder %s1103_s29, %s1363_s26 }
 0x3ea   : > { %p1105_p7 = pnand %p1104_p4, %p1251_p5 }
 0x3eb   : > { %p1110_p11 = por %p1109_p10, %p1108_p9 }
 0x3ec   : > { %p1106_p8 = pneg %p1105_p7 }
 0x3ed   : > { %p1112_p13 = por %p1111_p12, %p1110_p11 }
 0x3ef   : > { %p1113_p0 = pnand %p1112_p13, %p1106_p8 }
 0x3f1   : > { %1116 = shalt.err (!%p1113_p0)
}
 0x3f2   : > { %1028 = dma.vmem_to_hbm [thread:$0]  (%p1251_p5), %s1365_s20, 16, %s1363_s26, %s869_s17  }
 0x3f3 PF: > { %p1034_p1 = scmp.ge.s32.totalorder %s1151_s16, 2  ;;  %s893_s27 = sand.u32 1, %s1139_s13  }
 0x3f4   : > { %s894_s30 = scalar_lea.sflag [#allocation4], %s893_s27 }
 0x3f5   : > { %p1031_p2 = pnand %p1034_p1, %p1255_p6 }
 0x3f7   : > { %1134 = dma.done.wait (!%p1031_p2), %s894_s30, 16  }
 0x3f8   : > { %1136 = vsyncadd (!%p1031_p2), %s894_s30, 4294967280  ;;  %p20_p3 = scmp.ge.s32.totalorder %s1238_s19, 4   ;;  %s1418_s13 = smov %s1143_s14 }
 0x3f9   : > { %s1419_s14 = smov %s1147_s15  ;;  %s1420_s15 = smov %s1249_s22 }
 0x3fa   : > { %s1421_s16 = smov %s1238_s19  ;;  %22 = sbr.rel (!%p20_p3) target bundleno = 3 (0x3), region = 95 }
 0x401   :  { %898 = vsyncpa [#allocation4], 1 }
 0x402   :  { %900 = vsyncpa [#allocation4 + $0x1], 1 }

// kernel: tpu_custom_call.1
= control target key start
LH: loop header
LB: loop body
LE: loop exit
PB: predicated region body
PF: predicated region fallthrough
CT: control target
= control target key end

     0   :  { %15 = vsyncpa [#allocation4], 0  ;;  %s1405_s0 = inlined_call_operand.vmem [shape: f32[2,32,16], index: 0, kind: input, shape index: {}]   ;;  %s1406_s1 = inlined_call_operand.vmem [shape: f32[16,32], index: 1, kind: input, shape index: {}]   ;;  %s1407_s2 = inlined_call_operand.vmem [shape: f32[16,32], index: 2, kind: input, shape index: {}]   ;;  %s1408_s3 = inlined_call_operand.vmem [shape: bf16[32,96], index: 3, kind: input, shape index: {}]   ;;  %s1409_s4 = inlined_call_operand.vmem [shape: f32[1,96], index: 4, kind: input, shape index: {}]   ;;  %s1410_s5 = inlined_call_operand.vmem [shape: bf16[32,32], index: 5, kind: input, shape index: {}]   ;;  %s1411_s6 = inlined_call_operand.vmem [shape: bf16[32,32], index: 6, kind: input, shape index: {}]   ;;  %s1412_s7 = inlined_call_operand.vmem [shape: bf16[32,32], index: 7, kind: input, shape index: {}]   ;;  %s1413_s8 = inlined_call_operand.vmem [shape: bf16[32,32], index: 8, kind: input, shape index: {}]   ;;  %s1414_s9 = inlined_call_operand.vmem [shape: f32[1,32], index: 9, kind: input, shape index: {}]   ;;  %s1415_s10 = inlined_call_operand.hbm [shape: f32[2,1,32], index: 10, kind: output, shape index: {}]  }
   0x1   :  { %17 = vsyncpa [#allocation4 + $0x1], 0  ;;  %s1213_s13 = smov 0   ;;  %s1215_s14 = smov 0  }
   0x2   :  { %s1217_s15 = smov 0   ;;  %s1219_s16 = smov 0  }
   0x3 LB: > { %s1234_s17 = sadd.s32 4294967295, %s1151_s16   ;;  %s936_s18 = sadd.s32 4294967294, %s1151_s16   ;;  %s1151_s16 = sphi %s1219_s16, %s1421_s16   ;;  %s1147_s15 = sphi %s1217_s15, %s1420_s15   ;;  %s1143_s14 = sphi %s1215_s14, %s1419_s14   ;;  %s1139_s13 = sphi %s1213_s13, %s1418_s13  }
   0x4   : > { %s1238_s19 = sadd.s32 1, %s1151_s16   ;;  %s245_s20 = sadd.s32 1, %s1147_s15 }
   0x5   : > { %s242_s21 = ssub.s32 %s1151_s16, %s1238_s19  ;;  %p255_p0 = scmp.ne.s32.totalorder %s1147_s15, %s1143_s14 }
   0x6   : > { %p243_p1 = scmp.eq.s32.totalorder %s242_s21, 0  ;;  %p256_p2 = scmp.eq.s32.totalorder %s1234_s17, 1 }
   0x7   : > { %p261_p3 = scmp.ne.s32.totalorder %s1143_s14, %s1139_s13  ;;  %p262_p4 = scmp.eq.s32.totalorder %s936_s18, 1 }
   0x8   : > { %s1249_s22 = scalar_select %p243_p1, %s1147_s15, %s245_s20  }
   0x9   : > { %p1251_p5 = por %p256_p2, %p255_p0  ;;  %p1255_p6 = por %p262_p4, %p261_p3 }
   0xa   : > { %p939_p7 = scmp.ge.s32.totalorder %s1151_s16, 1  ;;  %p315_p8 = scmp.lt.s32.totalorder %s1151_s16, 3 }
   0xc   : > { %p316_p9 = pnand %p939_p7, %p315_p8 }
   0xd   : > { %p352_p10 = scmp.lt.s32.totalorder (!%p316_p9), %s1234_s17, 1  ;;  %vm362_vm0 = vcmask (!%p316_p9), 130048   ;;  %v1071_v8 = vld [vmem:[%s1408_s3] sm:$0xff] (!%p316_p9)   ;;  %v1153_v9 = vmov (!%p316_p9), 0.0   ;;  %v1072_v10 = vld [vmem:[%s1408_s3 + $0x8] sm:$0xff] (!%p316_p9)   ;;  %vm1154_vm1 = vmmov (!%p316_p9), 0   ;;  %v429_v13 = vlaneseq (!%p316_p9) }
   0xe   : > { %319 = sbr.rel (%p316_p9) target bundleno = 1011 (0x3f3), region = 60  ;;  %980 = vmatprep.subr.bf16.mxu0 (!%p316_p9), %v1153_v9  ;;  %988 = vmatprep.subr.bf16.mxu1 (!%p316_p9), %v1153_v9  ;;  %v1073_v11 = vld [vmem:[%s1410_s5] sm:$0xff] (!%p316_p9)   ;;  %v1074_v12 = vld [vmem:[%s1410_s5 + $0x8] sm:$0xff] (!%p316_p9)   ;;  %vm440_vm2 = vcmask (!%p316_p9), 130112   ;;  %vm447_vm3 = vcmask (!%p316_p9), 195712   ;;  %vm454_vm4 = vcmask (!%p316_p9), 261312  }
   0xf   : > { %981 = vmatpush3.bf16.msra.mxu0 (!%p316_p9), %v1071_v8  ;;  %984 = vmatprep.mubr.msk.bf16.mxu0 (!%p316_p9), %vm1154_vm1, %v1153_v9  ;;  %v430_v14 = vand.u32 (!%p316_p9), 127, %v429_v13  ;;  %v1288_v17 = vshrl.u32 (!%p316_p9), %v429_v13, 7  ;;  %vm413_vm5 = vcmask (!%p316_p9), 261120   ;;  %v1075_v49 = vld [vmem:[%s1412_s7] sm:$0xff] (!%p316_p9)   ;;  %v1076_v50 = vld [vmem:[%s1412_s7 + $0x8] sm:$0xff] (!%p316_p9)   ;;  %s1155_s18 = smov (!%p316_p9), 96  }
  0x10   : > { %982 = vmatprep.subr.bf16.mxu0 (!%p316_p9), %v1153_v9  ;;  %992 = vmatprep.mubr.msk.bf16.mxu1 (!%p316_p9), %vm1154_vm1, %v1153_v9  ;;  %v422_v51 = vld [vmem:[%s1409_s4] sm:$0x1] (!%p316_p9)  ;;  %s1156_s20 = smov (!%p316_p9), 64   ;;  %v574_v61 = vld [vmem:[%s1406_s1 + $0x8] sm:$0xff] (!%p316_p9)  ;;  %s958_s12 = sshll.u32 (!%p316_p9), %s1234_s17, 4  ;;  %vm866_vm6 = vcmask (!%p316_p9), 253952  }
  0x11   : > { %989 = vmatpush3.bf16.msra.mxu1 (!%p316_p9), %v1073_v11  ;;  %v442_v18 = vadd.s32 (!%p316_p9), 4294967280, %v430_v14  ;;  %v435_v19 = vadd.s32 (!%p316_p9), 4294967288, %v430_v14  ;;  %v449_v20 = vadd.s32 (!%p316_p9), 4294967272, %v430_v14  ;;  %v433_v29 = vsub.s32 (!%p316_p9), %v430_v14, %v1288_v17  ;;  %v573_v57 = vld [vmem:[%s1406_s1] sm:$0xff] (!%p316_p9)  ;;  %v1078_v8 = vld [vmem:[%s1411_s6 + $0x8] sm:$0xff] (!%p316_p9)   ;;  %s1157_s28 = smov (!%p316_p9), [#allocation3]  }
  0x12   : > { %990 = vmatprep.subr.bf16.mxu1 (!%p316_p9), %v1153_v9  ;;  %v583_v59 = vsub.s32 (!%p316_p9), 0, %v1288_v17  ;;  %v1079_v13 = vld [vmem:[%s1413_s8] sm:$0xff] (!%p316_p9)   ;;  %v1080_v14 = vld [vmem:[%s1413_s8 + $0x8] sm:$0xff] (!%p316_p9)   ;;  %s1093_s30 = sshll.u32 (!%p316_p9), %s1157_s28, 4  ;;  %s1094_s30 = int_to_ptr.vmem [resolvable:$false] %s1093_s30 }
  0x13   : > { %983 = vmatpush3.bf16.msra.mxu0 (!%p316_p9), %v1072_v10  ;;  %v445_v27 = vsub.s32 (!%p316_p9), %v442_v18, %v1288_v17  ;;  %v438_v30 = vsub.s32 (!%p316_p9), %v435_v19, %v1288_v17  ;;  %v452_v32 = vsub.s32 (!%p316_p9), %v449_v20, %v1288_v17  ;;  %s1095_s11 = scalar_lea.vmem (!%p316_p9), %s1094_s30, 32 }
  0x14   : > { %996 = vmatprep.subr.bf16.mxu0 (!%p316_p9), %v1153_v9 }
  0x15   : > { %s353_s25 = scalar_select %p352_p10, %s1234_s17, 1  ;;  %991 = vmatpush3.bf16.msra.mxu1 %v1074_v12 }
  0x16   : > { %1004 = vmatprep.subr.bf16.mxu1 %v1153_v9 }
  0x17   : > { %s961_s26 = sshll.u32 %s353_s25, 5 }
  0x18   : > { %s356_s29 = scalar_lea.vmem %s1405_s0, %s961_s26  ;;  %s1363_s26 = scalar_lea.hbm %s1415_s10, %s958_s12 }
  0x19   : > { %v360_v0 = vld [vmem:[%s356_s29 + $0x10] sm:$0xff]  ;;  %v358_v1 = vld [vmem:[%s356_s29] sm:$0xff]  ;;  %v361_v2 = vld [vmem:[%s356_s29 + $0x18] sm:$0xff] }
  0x1a   : > { %v369_v3 = vsel %vm362_vm0, %v360_v0, 0.0  ;;  %v363_v4 = vsel %vm362_vm0, %v358_v1, 0.0  ;;  %v359_v5 = vld [vmem:[%s356_s29 + $0x8] sm:$0xff]  ;;  %v372_v6 = vsel %vm362_vm0, %v361_v2, 0.0  ;;  %s350_s29 = sand.u32 1, %s1143_s14  }
  0x1b   : > { %370 = vadd.xlane.f32.xlu1 %v369_v3  ;;  %364 = vadd.xlane.f32.xlu0 %v363_v4  ;;  %v366_v7 = vsel %vm362_vm0, %v359_v5, 0.0  ;;  %s869_s17 = scalar_lea.sflag [#allocation4], %s350_s29 }
  0x1f   : > { %373 = vadd.xlane.f32.xlu1 %v372_v6  ;;  %367 = vadd.xlane.f32.xlu0 %v366_v7  ;;  %v1077_v6 = vld [vmem:[%s1411_s6] sm:$0xff]  }
  0x4c   : > { %380 = vxpose.xlu0.b32.start [1/4] (short) (narrow) %v358_v1, 16 }
  0x50   : > { %381 = vxpose.xlu0.b32.cont [2/4] (short) (narrow) %v359_v5, 16 }
  0x54   : > { %382 = vxpose.xlu0.b32.cont [3/4] (short) (narrow) %v360_v0, 16 }
  0x58   : > { %383 = vxpose.xlu0.b32.end [4/4] (short) (narrow) %v361_v2, 16 }
  0xa8   : > { %v371_v15 = vpop.xlane.xlu1 %370  ;;  %v365_v16 = vpop.xlane.xlu0 %364 }
  0xa9   : > { %v378_v23 = vmul.f32 0.0625, %v371_v15  ;;  %v376_v24 = vmul.f32 0.0625, %v365_v16 }
  0xac   : > { %v374_v21 = vpop.xlane.xlu1 %373  ;;  %v368_v22 = vpop.xlane.xlu0 %367 }
  0xad   : > { %v379_v25 = vmul.f32 0.0625, %v374_v21  ;;  %v377_v26 = vmul.f32 0.0625, %v368_v22 }
  0xaf   : > { %v417_v28 = vpack.c.bf16 %v379_v25, %v378_v23  ;;  %v416_v31 = vpack.c.bf16 %v377_v26, %v376_v24 }
  0xb1   : > { %v427_v33 = vunpack.c.l.b16 %v417_v28  ;;  %v428_v34 = vunpack.c.h.b16 %v417_v28  ;;  %v425_v35 = vunpack.c.l.b16 %v416_v31  ;;  %v426_v36 = vunpack.c.h.b16 %v416_v31 }
  0xb3   : > { %v446_v37 = vrot.slane %v427_v33, %v445_v27  ;;  %v434_v38 = vrot.slane %v425_v35, %v433_v29  ;;  %v439_v39 = vrot.slane %v426_v36, %v438_v30  ;;  %v453_v40 = vrot.slane %v428_v34, %v452_v32 }
  0xb5   : > { %v441_v41 = vsel %vm440_vm2, %v439_v39, %v434_v38 }
  0xb6   : > { %v448_v42 = vsel %vm447_vm3, %v446_v37, %v441_v41 }
  0xb7   : > { %v455_v43 = vsel %vm454_vm4, %v453_v40, %v448_v42  ;;  %v783_v42 = vld [vmem:[%s1407_s2] sm:$0xff] }
  0xb8   : > { %v456_v44 = vpack.c.b16 %v455_v43, %v455_v43  ;;  %v784_v43 = vld [vmem:[%s1407_s2 + $0x8] sm:$0xff] }
  0xba   : > { %985 = vmatmul.mubr.msk.bf16.vlgmr.msra.gmra.mrb[0].mxu0 %vm413_vm5, %v456_v44 }
  0xbb   : > { %1000 = vmatprep.mubr.msk.bf16.mxu0 %vm1154_vm1, %v1153_v9  ;;  %997 = vmatpush3.bf16.msra.mxu0 %v1075_v49 }
  0xbc   : > { %998 = vmatprep.subr.bf16.mxu0 %v1153_v9 }
  0xbf   : > { %999 = vmatpush3.bf16.msra.mxu0 %v1076_v50 }
  0xc0   : > { %1012 = vmatprep.subr.bf16.mxu0 %v1153_v9 }
  0xcc   : > { %v396_v45 = vpop.trf.xlu0 }
  0xd0   : > { %v397_v46 = vpop.trf.xlu0 }
  0xd1   : > { %v412_v47 = vpack.c.bf16 %v397_v46, %v396_v45 }
  0xd3   : > { %414 = vst.msk [vmem:[#allocation2] sm:$0xff] %vm413_vm5, %v412_v47 }
  0xda   : > { %v415_v48 = vld [vmem:[#allocation2] sm:$0xff] }
  0xdb   : > { %993 = vmatmul.mubr.msk.bf16.vlgmr.msra.gmra.mrb[0].mxu1 %vm413_vm5, %v415_v48 }
  0xdc   : > { %1008 = vmatprep.mubr.msk.bf16.mxu1 %vm1154_vm1, %v1153_v9  ;;  %1005 = vmatpush3.bf16.msra.mxu1 %v1075_v49 }
  0xdd   : > { %1006 = vmatprep.subr.bf16.mxu1 %v1153_v9 }
  0xe0   : > { %1007 = vmatpush3.bf16.msra.mxu1 %v1076_v50 }
  0xe1   : > { %1020 = vmatprep.subr.bf16.mxu1 %v1153_v9 }
 0x18d   : > { %v506_v52 = vpop.f32.mrb[0].mxu0 }
 0x18e   : > { %v507_v53 = vadd.f32 %v506_v52, %v422_v51  ;;  %v986_v54 = vpop.f32.mrb[1].mxu0 }
 0x18f   : > { %v509_v55 = vpop.f32.mrb[2].mxu0 }
 0x190   : > { %645 = vrot.lane.b32.xlu1 %v507_v53, %s1155_s18  ;;  %v987_v56 = vpop.f32.mrb[3].mxu0  ;;  %v512_v58 = vmul.f32 0.35355338, %v507_v53  ;;  %s351_s18 = scalar_lea.vmem [#allocation3], %s350_s29 }
 0x192   : > { %v584_v1 = vrot.slane %v512_v58, %v583_v59 }
 0x194   : > { %787 = vrot.lane.b32.xlu1 %v507_v53, %s1156_s20  ;;  %s881_s20 = sshll.u32 %s351_s18, 4  ;;  %s1365_s20 = int_to_ptr.vmem [resolvable:$true] %s881_s20 }
 0x195   : > { %s1089_s27 = scalar_lea.vmem %s1365_s20, 16  ;;  %p1096_p0 = scmp.lt.s32.totalorder %s1365_s20, %s1094_s30 }
 0x196   : > { %p1090_p11 = scmp.ne.s32.totalorder %s1365_s20, %s1089_s27  ;;  %p1097_p1 = scmp.lt.s32.totalorder %s1095_s11, %s1089_s27 }
 0x198   : > { %p1091_p12 = pnand %p1090_p11, %p1251_p5  ;;  %p1098_p2 = por %p1097_p1, %p1096_p0 }
 0x19a   : > { %p1092_p13 = pneg %p1091_p12 }
 0x19c   : > { %p1099_p3 = pnand %p1098_p2, %p1092_p13 }
 0x1ae   : > { %v566_v60 = vpop.f32.mrb[0].mxu1 }
 0x1af   : > { %v575_v62 = vadd.f32 %v573_v57, %v566_v60  ;;  %v994_v63 = vpop.f32.mrb[1].mxu1 }
 0x1b0   : > { %v569_v0 = vpop.f32.mrb[2].mxu1 }
 0x1b1   : > { %v576_v2 = vadd.f32 %v574_v61, %v569_v0  ;;  %v995_v3 = vpop.f32.mrb[3].mxu1  ;;  %v585_v4 = vmul.f32 %v584_v1, %v575_v62 }
 0x1b3   : > { %v586_v5 = vmul.f32 %v584_v1, %v576_v2 }
 0x1b5   : > { %v587_v7 = vpack.c.bf16 %v586_v5, %v585_v4 }
 0x1b7   : > { %1001 = vmatmul.mubr.msk.bf16.vlgmr.msra.gmra.mrb[4].mxu0 %vm413_vm5, %v587_v7 }
 0x1b8   : > { %1013 = vmatpush3.bf16.msra.mxu0 %v1077_v6  ;;  %1016 = vmatprep.mubr.msk.bf16.mxu0 %vm1154_vm1, %v1153_v9 }
 0x1b9   : > { %1014 = vmatprep.subr.bf16.mxu0 %v1153_v9 }
 0x1bc   : > { %1015 = vmatpush3.bf16.msra.mxu0 %v1078_v8 }
 0x1bf   : > { %1017 = vmatmul.mubr.msk.bf16.vlgmr.msra.gmra.mrb[8].mxu0 %vm413_vm5, %v415_v48 }
 0x202   : > { %v646_v10 = vpop.permute.xlu1 %645 }
 0x203   : > { %v648_v11 = vmul.f32 %v646_v10, %v512_v58 }
 0x205   : > { %v649_v12 = vpack.c.bf16 %v648_v11, %v648_v11 }
 0x206   : > { %v788_v5 = vpop.permute.xlu1 %787 }
 0x207   : > { %1009 = vmatmul.mubr.msk.bf16.vlgmr.msra.gmra.mrb[4].mxu1 %vm413_vm5, %v649_v12 }
 0x208   : > { %1024 = vmatprep.mubr.msk.bf16.mxu1 %vm1154_vm1, %v1153_v9  ;;  %1021 = vmatpush3.bf16.msra.mxu1 %v1079_v13 }
 0x209   : > { %1022 = vmatprep.subr.bf16.mxu1 %v1153_v9 }
 0x20c   : > { %1023 = vmatpush3.bf16.msra.mxu1 %v1080_v14  ;;  %v810_v14 = vld [vmem:[%s1414_s9] sm:$0x1] }
 0x28a   : > { %v637_v15 = vpop.f32.mrb[4].mxu0 }
 0x28b   : > { %v1002_v16 = vpop.f32.mrb[5].mxu0  ;;  %v693_v18 = vsel %vm413_vm5, %v637_v15, -inf }
 0x28c   : > { %v640_v17 = vpop.f32.mrb[6].mxu0 }
 0x28d   : > { %v694_v19 = vsel %vm413_vm5, %v640_v17, -inf  ;;  %v1003_v20 = vpop.f32.mrb[7].mxu0 }
 0x28e   : > { %v695_v21 = vmax.f32 %v693_v18, %v694_v19 }
 0x290   : > { %v696_v26 = vrot.slane %v695_v21, 4 }
 0x292   : > { %v776_v22 = vpop.f32.mrb[8].mxu0  ;;  %v697_v27 = vmax.f32 %v695_v21, %v696_v26 }
 0x293   : > { %v1018_v23 = vpop.f32.mrb[9].mxu0  ;;  %v785_v44 = vadd.f32 %v783_v42, %v776_v22 }
 0x294   : > { %v779_v24 = vpop.f32.mrb[10].mxu0  ;;  %v698_v28 = vrot.slane %v697_v27, 2 }
 0x295   : > { %v1019_v25 = vpop.f32.mrb[11].mxu0  ;;  %v786_v46 = vadd.f32 %v784_v43, %v779_v24 }
 0x296   : > { %v699_v29 = vmax.f32 %v697_v27, %v698_v28 }
 0x298   : > { %v700_v30 = vrot.slane %v699_v29, 1 }
 0x29a   : > { %v701_v9 = vmax.f32 %v699_v29, %v700_v30 }
 0x2da   : > { %v687_v31 = vpop.f32.mrb[4].mxu1 }
 0x2db   : > { %v702_v32 = vmax.f32 %v701_v9, %v687_v31  ;;  %v1010_v33 = vpop.f32.mrb[5].mxu1 }
 0x2dc   : > { %v690_v34 = vpop.f32.mrb[6].mxu1 }
 0x2dd   : > { %v706_v35 = vrot.slane %v702_v32, %v583_v59  ;;  %v713_v36 = vsub.f32 %v687_v31, %v702_v32  ;;  %v1011_v37 = vpop.f32.mrb[7].mxu1 }
 0x2df   : > { %v707_v38 = vsub.f32 %v637_v15, %v706_v35  ;;  %v708_v39 = vsub.f32 %v640_v17, %v706_v35  ;;  %v714_v47 = vmul.f32 1.442695, %v713_v36 }
 0x2e1   : > { %v709_v40 = vmul.f32 1.442695, %v707_v38  ;;  %v711_v41 = vmul.f32 1.442695, %v708_v39 }
 0x2e3   : > { %1081 = vpow2.f32 %v709_v40 }
 0x2e4   : > { %1083 = vpow2.f32 %v711_v41 }
 0x2e5   : > { %1085 = vpow2.f32 %v714_v47 }
 0x2ed   : > { %v1082_v45 = vpop.eup %1081 }
 0x2ee   : > { %v1084_v48 = vpop.eup %1083  ;;  %v716_v49 = vsel %vm413_vm5, %v1082_v45, 0.0  ;;  %v791_v50 = vmul.f32 %v1082_v45, %v785_v44 }
 0x2ef   : > { %v717_v51 = vsel %vm413_vm5, %v1084_v48, 0.0  ;;  %v792_v52 = vmul.f32 %v1084_v48, %v786_v46  ;;  %v1086_v2 = vpop.eup %1085 }
 0x2f0   : > { %v718_v53 = vadd.f32 %v717_v51, %v716_v49  ;;  %v793_v54 = vsel %vm413_vm5, %v791_v50, 0.0  ;;  %v790_v7 = vmul.f32 %v1086_v2, %v788_v5 }
 0x2f1   : > { %v794_v55 = vsel %vm413_vm5, %v792_v52, 0.0 }
 0x2f2   : > { %v719_v56 = vrot.slane %v718_v53, 4  ;;  %v795_v57 = vadd.f32 %v794_v55, %v793_v54 }
 0x2f4   : > { %v720_v58 = vadd.f32 %v719_v56, %v718_v53  ;;  %v796_v59 = vrot.slane %v795_v57, 4 }
 0x2f6   : > { %v721_v60 = vrot.slane %v720_v58, 2  ;;  %v797_v61 = vadd.f32 %v796_v59, %v795_v57 }
 0x2f8   : > { %v722_v62 = vadd.f32 %v721_v60, %v720_v58  ;;  %v798_v63 = vrot.slane %v797_v61, 2 }
 0x2fa   : > { %v723_v0 = vrot.slane %v722_v62, 1  ;;  %v799_v1 = vadd.f32 %v798_v63, %v797_v61 }
 0x2fc   : > { %v724_v3 = vadd.f32 %v723_v0, %v722_v62  ;;  %v800_v4 = vrot.slane %v799_v1, 1 }
 0x2fe   : > { %v725_v6 = vadd.f32 %v1086_v2, %v724_v3  ;;  %v801_v8 = vadd.f32 %v800_v4, %v799_v1 }
 0x300   : > { %1087 = vrcp.f32 %v725_v6  ;;  %v802_v10 = vadd.f32 %v801_v8, %v790_v7 }
 0x30a   : > { %v1088_v11 = vpop.eup %1087 }
 0x30b   : > { %v804_v12 = vmul.f32 %v1088_v11, %v802_v10 }
 0x30d   : > { %v805_v13 = vpack.c.bf16 %v804_v12, %v804_v12 }
 0x30f   : > { %1025 = vmatmul.mubr.msk.bf16.vlgmr.msra.gmra.mrb[8].mxu1 %vm413_vm5, %v805_v13 }
 0x3e2   : > { %v860_v15 = vpop.f32.mrb[8].mxu1 }
 0x3e3   : > { %v861_v16 = vadd.f32 %v860_v15, %v810_v14  ;;  %v1026_v17 = vpop.f32.mrb[9].mxu1 }
 0x3e4   : > { %v863_v18 = vpop.f32.mrb[10].mxu1 }
 0x3e5   : > { %v1027_v19 = vpop.f32.mrb[11].mxu1  ;;  %867 = vst.msk [vmem:[%s351_s18] sm:$0x1] %vm866_vm6, %v861_v16 }
 0x3e6   : > { %1102 = shalt.err (!%p1099_p3)
}
 0x3e7   : > { %s1103_s29 = scalar_lea.hbm %s1363_s26, 16  ;;  %s1107_s21 = scalar_lea.hbm %s1415_s10, 32 }
 0x3e8   : > { %p1104_p4 = scmp.ne.s32.totalorder %s1363_s26, %s1103_s29  ;;  %p1108_p9 = scmp.lt.u32.totalorder %s1363_s26, %s1415_s10 }
 0x3e9   : > { %p1109_p10 = scmp.lt.u32.totalorder %s1107_s21, %s1103_s29  ;;  %p1111_p12 = scmp.lt.u32.totalorder %s1103_s29, %s1363_s26 }
 0x3ea   : > { %p1105_p7 = pnand %p1104_p4, %p1251_p5 }
 0x3eb   : > { %p1110_p11 = por %p1109_p10, %p1108_p9 }
 0x3ec   : > { %p1106_p8 = pneg %p1105_p7 }
 0x3ed   : > { %p1112_p13 = por %p1111_p12, %p1110_p11 }
 0x3ef   : > { %p1113_p0 = pnand %p1112_p13, %p1106_p8 }
 0x3f1   : > { %1116 = shalt.err (!%p1113_p0)
}
 0x3f2   : > { %1028 = dma.vmem_to_hbm [thread:$0]  (%p1251_p5), %s1365_s20, 16, %s1363_s26, %s869_s17  }
 0x3f3 PF: > { %p1034_p1 = scmp.ge.s32.totalorder %s1151_s16, 2  ;;  %s893_s27 = sand.u32 1, %s1139_s13  }
 0x3f4   : > { %s894_s30 = scalar_lea.sflag [#allocation4], %s893_s27 }
 0x3f5   : > { %p1031_p2 = pnand %p1034_p1, %p1255_p6 }
 0x3f7   : > { %1134 = dma.done.wait (!%p1031_p2), %s894_s30, 16  }
 0x3f8   : > { %1136 = vsyncadd (!%p1031_p2), %s894_s30, 4294967280  ;;  %p20_p3 = scmp.ge.s32.totalorder %s1238_s19, 4   ;;  %s1418_s13 = smov %s1143_s14 }
 0x3f9   : > { %s1419_s14 = smov %s1147_s15  ;;  %s1420_s15 = smov %s1249_s22 }
 0x3fa   : > { %s1421_s16 = smov %s1238_s19  ;;  %22 = sbr.rel (!%p20_p3) target bundleno = 3 (0x3), region = 95 }
 0x401   :  { %898 = vsyncpa [#allocation4], 1 }
 0x402   :  { %900 = vsyncpa [#allocation4 + $0x1], 1 }

</bundles_post_ra>
